<compile_context>
chip_gen: v6e
topology: v6e:2x2x1
jax: 0.10.0
libtpu: 0.0.40
codegen_flags: <defaults>
</compile_context>

<pallas_src>
import functools

import jax
import jax.numpy as jnp
import numpy as np
from jax.experimental import pallas as pl
from jax.experimental.pallas import tpu as pltpu


def spatial_attn_kernel(w_ref, x_ref, o_ref, featp_ref, *, ksize, pad):
    """Fused spatial-attention forward for one image of the batch.

    w_ref     : SMEM (2*K*K,)             conv weight, flattened (c, kh, kw)
    x_ref     : VMEM (C, H, W)            one input image (NCHW block)
    o_ref     : VMEM (H, W)               sigmoid(conv(concat(mean_c, max_c)))
    featp_ref : VMEM (2, H+2P, W+2P)      scratch: zero-padded 2-channel features
    """
    C, H, W = x_ref.shape
    x = x_ref[...].astype(jnp.float32)

    avg = jnp.mean(x, axis=0)            # (H, W) channel mean
    mx = jnp.max(x, axis=0)              # (H, W) channel max

    # Zero-fill the halo and write the two reduced channels into padded scratch
    # (padding handled in VMEM -> no padded HBM copy).
    featp_ref[...] = jnp.zeros_like(featp_ref)
    featp_ref[0, pad:pad + H, pad:pad + W] = avg
    featp_ref[1, pad:pad + H, pad:pad + W] = mx

    # KxK cross-correlation, 2 input channels, 1 output channel, stride 1.
    # Scalar weights come from SMEM; each tap is a scalar * (H, W) multiply-add.
    acc = jnp.zeros((H, W), jnp.float32)
    for c in range(2):
        for kh in range(ksize):
            for kw in range(ksize):
                tap = featp_ref[c, kh:kh + H, kw:kw + W]
                acc = acc + tap * w_ref[(c * ksize + kh) * ksize + kw]

    # Exact sigmoid (EUP exp + exact divide keeps us well inside 1e-4 tolerance).
    o_ref[...] = (1.0 / (1.0 + jnp.exp(-acc))).astype(o_ref.dtype)


def spatial_attention(x, w):
    """Forward pass of the PyTorch SpatialAttention module.

    x : (N, C, H, W)   input feature map (NCHW, as in PyTorch)
    w : (1, 2, K, K)   conv weight (PyTorch OIHW layout), bias-free
    returns (N, 1, H, W)
    """
    N, C, H, W = x.shape
    ksize = int(w.shape[-1])
    pad = ksize // 2
    w_flat = w.reshape(-1).astype(jnp.float32)            # (2*K*K,) -> SMEM

    # TODO(synk): add H-axis spatial tiling with a `pad`-row halo for images too
    # large for whole-image VMEM blocks (not needed at these test sizes).
    out = pl.pallas_call(
        functools.partial(spatial_attn_kernel, ksize=ksize, pad=pad),
        out_shape=jax.ShapeDtypeStruct((N, H, W), jnp.float32),
        grid_spec=pltpu.PrefetchScalarGridSpec(
            num_scalar_prefetch=0,
            grid=(N,),
            in_specs=[
                # Tiny weight table lives in SMEM for cheap scalar reads.
                pl.BlockSpec(memory_space=pltpu.MemorySpace.SMEM),
                # One whole image per grid step, NCHW layout (W on lanes).
                pl.BlockSpec((None, C, H, W), lambda n: (n, 0, 0, 0)),
            ],
            out_specs=pl.BlockSpec((None, H, W), lambda n: (n, 0, 0)),
            scratch_shapes=[
                pltpu.VMEM((2, H + 2 * pad, W + 2 * pad), jnp.float32),
            ],
        ),
        compiler_params=pltpu.CompilerParams(
            dimension_semantics=("parallel",),   # batch axis independent -> megacore OK
        ),
    )(w_flat, x)

    return out.reshape(N, 1, H, W)


def ref_forward(x, w):
    """Pure-JAX reference with PyTorch semantics (NCHW)."""
    avg = jnp.mean(x, axis=1, keepdims=True)
    mx = jnp.max(x, axis=1, keepdims=True)
    feat = jnp.concatenate([avg, mx], axis=1)
    pad = w.shape[-1] // 2
    out = jax.lax.conv_general_dilated(
        feat, w, window_strides=(1, 1), padding=((pad, pad), (pad, pad)),
        dimension_numbers=("NCHW", "OIHW", "NCHW"))
    return jax.nn.sigmoid(out)


if __name__ == "__main__":
    N, C, H, W, K = 2, 4, 16, 16, 7

    key = jax.random.PRNGKey(0)
    kx, kw = jax.random.split(key)
    x = jax.random.normal(kx, (N, C, H, W), dtype=jnp.float32)
    # Conv2d(2, 1, kernel_size=7, bias=False) weight, deterministic init.
    w = jax.random.normal(kw, (1, 2, K, K), dtype=jnp.float32) * 0.1

    out = spatial_attention(x, w)
    out = jax.block_until_ready(out)

    ref = jax.block_until_ready(ref_forward(x, w))
    np.testing.assert_allclose(np.asarray(out), np.asarray(ref), rtol=1e-4, atol=1e-4)

    print("KERNEL_OK")
</pallas_src>

<mosaic_0001>
module attributes {stable_mosaic.version = 11 : i64} {
  func.func @spatial_attn_kernel(%arg0: i32, %arg1: memref<98xf32, #tpu.memory_space<smem>>, %arg2: memref<1x4x16x16xf32, #tpu.memory_space<vmem>>, %arg3: memref<1x16x16xf32, #tpu.memory_space<vmem>>, %arg4: memref<2x22x22xf32, #tpu.memory_space<vmem>>) attributes {dimension_semantics = [#tpu.dimension_semantics<parallel>], iteration_bounds = array<i64: 2>, scalar_prefetch = 0 : i64, scratch_operands = 1 : i64, tpu.core_type = #tpu.core_type<tc>, window_params = [{transform_indices = @transform_0, window_bounds = array<i64: 98>}, {transform_indices = @transform_1, window_bounds = array<i64: 1, 4, 16, 16>}, {transform_indices = @transform_2, window_bounds = array<i64: 1, 16, 16>}]} {
    %c0 = arith.constant 0 : index
    %c0_0 = arith.constant 0 : index
    %c0_1 = arith.constant 0 : index
    %c0_2 = arith.constant 0 : index
    %0 = vector.load %arg2[%c0, %c0_0, %c0_1, %c0_2] : memref<1x4x16x16xf32, #tpu.memory_space<vmem>>, vector<1x4x16x16xf32>
    %1 = vector.shape_cast %0 : vector<1x4x16x16xf32> to vector<4x16x16xf32>
    %cst = arith.constant dense<0.000000e+00> : vector<16x16xf32>
    %2 = vector.multi_reduction <add>, %1, %cst [0] : vector<4x16x16xf32> to vector<16x16xf32>
    %cst_3 = arith.constant 4.000000e+00 : f32
    %3 = vector.broadcast %cst_3 : f32 to vector<16x16xf32>
    %4 = arith.divf %2, %3 : vector<16x16xf32>
    %cst_4 = arith.constant dense<0xFF800000> : vector<16x16xf32>
    %5 = vector.multi_reduction <maximumf>, %1, %cst_4 [0] : vector<4x16x16xf32> to vector<16x16xf32>
    %cst_5 = arith.constant 0.000000e+00 : f32
    %6 = vector.broadcast %cst_5 : f32 to vector<2x22x22xf32>
    %c0_6 = arith.constant 0 : index
    %c0_7 = arith.constant 0 : index
    %c0_8 = arith.constant 0 : index
    %7 = vector.load %arg4[%c0_6, %c0_7, %c0_8] : memref<2x22x22xf32, #tpu.memory_space<vmem>>, vector<2x22x22xf32>
    tpu.vector_store %arg4[%c0_6, %c0_7, %c0_8], %6 {strides = array<i32>} : memref<2x22x22xf32, #tpu.memory_space<vmem>>, vector<2x22x22xf32>,
    %c0_9 = arith.constant 0 : index
    %c3 = arith.constant 3 : index
    %c3_10 = arith.constant 3 : index
    %8 = vector.load %arg4[%c0_9, %c3, %c3_10] : memref<2x22x22xf32, #tpu.memory_space<vmem>>, vector<1x16x16xf32>
    %9 = vector.shape_cast %8 : vector<1x16x16xf32> to vector<16x16xf32>
    %10 = vector.shape_cast %4 : vector<16x16xf32> to vector<1x16x16xf32>
    tpu.vector_store %arg4[%c0_9, %c3, %c3_10], %10 {strides = array<i32>} : memref<2x22x22xf32, #tpu.memory_space<vmem>>, vector<1x16x16xf32>,
    %c1 = arith.constant 1 : index
    %c3_11 = arith.constant 3 : index
    %c3_12 = arith.constant 3 : index
    %11 = vector.load %arg4[%c1, %c3_11, %c3_12] : memref<2x22x22xf32, #tpu.memory_space<vmem>>, vector<1x16x16xf32>
    %12 = vector.shape_cast %11 : vector<1x16x16xf32> to vector<16x16xf32>
    %13 = vector.shape_cast %5 : vector<16x16xf32> to vector<1x16x16xf32>
    tpu.vector_store %arg4[%c1, %c3_11, %c3_12], %13 {strides = array<i32>} : memref<2x22x22xf32, #tpu.memory_space<vmem>>, vector<1x16x16xf32>,
    %cst_13 = arith.constant 0.000000e+00 : f32
    %14 = vector.broadcast %cst_13 : f32 to vector<16x16xf32>
    %c0_14 = arith.constant 0 : index
    %c0_15 = arith.constant 0 : index
    %c0_16 = arith.constant 0 : index
    %15 = vector.load %arg4[%c0_14, %c0_15, %c0_16] : memref<2x22x22xf32, #tpu.memory_space<vmem>>, vector<1x16x16xf32>
    %16 = vector.shape_cast %15 : vector<1x16x16xf32> to vector<16x16xf32>
    %c0_17 = arith.constant 0 : index
    %17 = memref.load %arg1[%c0_17] : memref<98xf32, #tpu.memory_space<smem>>
    %18 = vector.broadcast %17 : f32 to vector<16x16xf32>
    %19 = arith.mulf %16, %18 : vector<16x16xf32>
    %20 = arith.addf %14, %19 : vector<16x16xf32>
    %c0_18 = arith.constant 0 : index
    %c0_19 = arith.constant 0 : index
    %c1_20 = arith.constant 1 : index
    %21 = vector.load %arg4[%c0_18, %c0_19, %c1_20] : memref<2x22x22xf32, #tpu.memory_space<vmem>>, vector<1x16x16xf32>
    %22 = vector.shape_cast %21 : vector<1x16x16xf32> to vector<16x16xf32>
    %c1_21 = arith.constant 1 : index
    %23 = memref.load %arg1[%c1_21] : memref<98xf32, #tpu.memory_space<smem>>
    %24 = vector.broadcast %23 : f32 to vector<16x16xf32>
    %25 = arith.mulf %22, %24 : vector<16x16xf32>
    %26 = arith.addf %20, %25 : vector<16x16xf32>
    %c0_22 = arith.constant 0 : index
    %c0_23 = arith.constant 0 : index
    %c2 = arith.constant 2 : index
    %27 = vector.load %arg4[%c0_22, %c0_23, %c2] : memref<2x22x22xf32, #tpu.memory_space<vmem>>, vector<1x16x16xf32>
    %28 = vector.shape_cast %27 : vector<1x16x16xf32> to vector<16x16xf32>
    %c2_24 = arith.constant 2 : index
    %29 = memref.load %arg1[%c2_24] : memref<98xf32, #tpu.memory_space<smem>>
    %30 = vector.broadcast %29 : f32 to vector<16x16xf32>
    %31 = arith.mulf %28, %30 : vector<16x16xf32>
    %32 = arith.addf %26, %31 : vector<16x16xf32>
    %c0_25 = arith.constant 0 : index
    %c0_26 = arith.constant 0 : index
    %c3_27 = arith.constant 3 : index
    %33 = vector.load %arg4[%c0_25, %c0_26, %c3_27] : memref<2x22x22xf32, #tpu.memory_space<vmem>>, vector<1x16x16xf32>
    %34 = vector.shape_cast %33 : vector<1x16x16xf32> to vector<16x16xf32>
    %c3_28 = arith.constant 3 : index
    %35 = memref.load %arg1[%c3_28] : memref<98xf32, #tpu.memory_space<smem>>
    %36 = vector.broadcast %35 : f32 to vector<16x16xf32>
    %37 = arith.mulf %34, %36 : vector<16x16xf32>
    %38 = arith.addf %32, %37 : vector<16x16xf32>
    %c0_29 = arith.constant 0 : index
    %c0_30 = arith.constant 0 : index
    %c4 = arith.constant 4 : index
    %39 = vector.load %arg4[%c0_29, %c0_30, %c4] : memref<2x22x22xf32, #tpu.memory_space<vmem>>, vector<1x16x16xf32>
    %40 = vector.shape_cast %39 : vector<1x16x16xf32> to vector<16x16xf32>
    %c4_31 = arith.constant 4 : index
    %41 = memref.load %arg1[%c4_31] : memref<98xf32, #tpu.memory_space<smem>>
    %42 = vector.broadcast %41 : f32 to vector<16x16xf32>
    %43 = arith.mulf %40, %42 : vector<16x16xf32>
    %44 = arith.addf %38, %43 : vector<16x16xf32>
    %c0_32 = arith.constant 0 : index
    %c0_33 = arith.constant 0 : index
    %c5 = arith.constant 5 : index
    %45 = vector.load %arg4[%c0_32, %c0_33, %c5] : memref<2x22x22xf32, #tpu.memory_space<vmem>>, vector<1x16x16xf32>
    %46 = vector.shape_cast %45 : vector<1x16x16xf32> to vector<16x16xf32>
    %c5_34 = arith.constant 5 : index
    %47 = memref.load %arg1[%c5_34] : memref<98xf32, #tpu.memory_space<smem>>
    %48 = vector.broadcast %47 : f32 to vector<16x16xf32>
    %49 = arith.mulf %46, %48 : vector<16x16xf32>
    %50 = arith.addf %44, %49 : vector<16x16xf32>
    %c0_35 = arith.constant 0 : index
    %c0_36 = arith.constant 0 : index
    %c6 = arith.constant 6 : index
    %51 = vector.load %arg4[%c0_35, %c0_36, %c6] : memref<2x22x22xf32, #tpu.memory_space<vmem>>, vector<1x16x16xf32>
    %52 = vector.shape_cast %51 : vector<1x16x16xf32> to vector<16x16xf32>
    %c6_37 = arith.constant 6 : index
    %53 = memref.load %arg1[%c6_37] : memref<98xf32, #tpu.memory_space<smem>>
    %54 = vector.broadcast %53 : f32 to vector<16x16xf32>
    %55 = arith.mulf %52, %54 : vector<16x16xf32>
    %56 = arith.addf %50, %55 : vector<16x16xf32>
    %c0_38 = arith.constant 0 : index
    %c1_39 = arith.constant 1 : index
    %c0_40 = arith.constant 0 : index
    %57 = vector.load %arg4[%c0_38, %c1_39, %c0_40] : memref<2x22x22xf32, #tpu.memory_space<vmem>>, vector<1x16x16xf32>
    %58 = vector.shape_cast %57 : vector<1x16x16xf32> to vector<16x16xf32>
    %c7 = arith.constant 7 : index
    %59 = memref.load %arg1[%c7] : memref<98xf32, #tpu.memory_space<smem>>
    %60 = vector.broadcast %59 : f32 to vector<16x16xf32>
    %61 = arith.mulf %58, %60 : vector<16x16xf32>
    %62 = arith.addf %56, %61 : vector<16x16xf32>
    %c0_41 = arith.constant 0 : index
    %c1_42 = arith.constant 1 : index
    %c1_43 = arith.constant 1 : index
    %63 = vector.load %arg4[%c0_41, %c1_42, %c1_43] : memref<2x22x22xf32, #tpu.memory_space<vmem>>, vector<1x16x16xf32>
    %64 = vector.shape_cast %63 : vector<1x16x16xf32> to vector<16x16xf32>
    %c8 = arith.constant 8 : index
    %65 = memref.load %arg1[%c8] : memref<98xf32, #tpu.memory_space<smem>>
    %66 = vector.broadcast %65 : f32 to vector<16x16xf32>
    %67 = arith.mulf %64, %66 : vector<16x16xf32>
    %68 = arith.addf %62, %67 : vector<16x16xf32>
    %c0_44 = arith.constant 0 : index
    %c1_45 = arith.constant 1 : index
    %c2_46 = arith.constant 2 : index
    %69 = vector.load %arg4[%c0_44, %c1_45, %c2_46] : memref<2x22x22xf32, #tpu.memory_space<vmem>>, vector<1x16x16xf32>
    %70 = vector.shape_cast %69 : vector<1x16x16xf32> to vector<16x16xf32>
    %c9 = arith.constant 9 : index
    %71 = memref.load %arg1[%c9] : memref<98xf32, #tpu.memory_space<smem>>
    %72 = vector.broadcast %71 : f32 to vector<16x16xf32>
    %73 = arith.mulf %70, %72 : vector<16x16xf32>
    %74 = arith.addf %68, %73 : vector<16x16xf32>
    %c0_47 = arith.constant 0 : index
    %c1_48 = arith.constant 1 : index
    %c3_49 = arith.constant 3 : index
    %75 = vector.load %arg4[%c0_47, %c1_48, %c3_49] : memref<2x22x22xf32, #tpu.memory_space<vmem>>, vector<1x16x16xf32>
    %76 = vector.shape_cast %75 : vector<1x16x16xf32> to vector<16x16xf32>
    %c10 = arith.constant 10 : index
    %77 = memref.load %arg1[%c10] : memref<98xf32, #tpu.memory_space<smem>>
    %78 = vector.broadcast %77 : f32 to vector<16x16xf32>
    %79 = arith.mulf %76, %78 : vector<16x16xf32>
    %80 = arith.addf %74, %79 : vector<16x16xf32>
    %c0_50 = arith.constant 0 : index
    %c1_51 = arith.constant 1 : index
    %c4_52 = arith.constant 4 : index
    %81 = vector.load %arg4[%c0_50, %c1_51, %c4_52] : memref<2x22x22xf32, #tpu.memory_space<vmem>>, vector<1x16x16xf32>
    %82 = vector.shape_cast %81 : vector<1x16x16xf32> to vector<16x16xf32>
    %c11 = arith.constant 11 : index
    %83 = memref.load %arg1[%c11] : memref<98xf32, #tpu.memory_space<smem>>
    %84 = vector.broadcast %83 : f32 to vector<16x16xf32>
    %85 = arith.mulf %82, %84 : vector<16x16xf32>
    %86 = arith.addf %80, %85 : vector<16x16xf32>
    %c0_53 = arith.constant 0 : index
    %c1_54 = arith.constant 1 : index
    %c5_55 = arith.constant 5 : index
    %87 = vector.load %arg4[%c0_53, %c1_54, %c5_55] : memref<2x22x22xf32, #tpu.memory_space<vmem>>, vector<1x16x16xf32>
    %88 = vector.shape_cast %87 : vector<1x16x16xf32> to vector<16x16xf32>
    %c12 = arith.constant 12 : index
    %89 = memref.load %arg1[%c12] : memref<98xf32, #tpu.memory_space<smem>>
    %90 = vector.broadcast %89 : f32 to vector<16x16xf32>
    %91 = arith.mulf %88, %90 : vector<16x16xf32>
    %92 = arith.addf %86, %91 : vector<16x16xf32>
    %c0_56 = arith.constant 0 : index
    %c1_57 = arith.constant 1 : index
    %c6_58 = arith.constant 6 : index
    %93 = vector.load %arg4[%c0_56, %c1_57, %c6_58] : memref<2x22x22xf32, #tpu.memory_space<vmem>>, vector<1x16x16xf32>
    %94 = vector.shape_cast %93 : vector<1x16x16xf32> to vector<16x16xf32>
    %c13 = arith.constant 13 : index
    %95 = memref.load %arg1[%c13] : memref<98xf32, #tpu.memory_space<smem>>
    %96 = vector.broadcast %95 : f32 to vector<16x16xf32>
    %97 = arith.mulf %94, %96 : vector<16x16xf32>
    %98 = arith.addf %92, %97 : vector<16x16xf32>
    %c0_59 = arith.constant 0 : index
    %c2_60 = arith.constant 2 : index
    %c0_61 = arith.constant 0 : index
    %99 = vector.load %arg4[%c0_59, %c2_60, %c0_61] : memref<2x22x22xf32, #tpu.memory_space<vmem>>, vector<1x16x16xf32>
    %100 = vector.shape_cast %99 : vector<1x16x16xf32> to vector<16x16xf32>
    %c14 = arith.constant 14 : index
    %101 = memref.load %arg1[%c14] : memref<98xf32, #tpu.memory_space<smem>>
    %102 = vector.broadcast %101 : f32 to vector<16x16xf32>
    %103 = arith.mulf %100, %102 : vector<16x16xf32>
    %104 = arith.addf %98, %103 : vector<16x16xf32>
    %c0_62 = arith.constant 0 : index
    %c2_63 = arith.constant 2 : index
    %c1_64 = arith.constant 1 : index
    %105 = vector.load %arg4[%c0_62, %c2_63, %c1_64] : memref<2x22x22xf32, #tpu.memory_space<vmem>>, vector<1x16x16xf32>
    %106 = vector.shape_cast %105 : vector<1x16x16xf32> to vector<16x16xf32>
    %c15 = arith.constant 15 : index
    %107 = memref.load %arg1[%c15] : memref<98xf32, #tpu.memory_space<smem>>
    %108 = vector.broadcast %107 : f32 to vector<16x16xf32>
    %109 = arith.mulf %106, %108 : vector<16x16xf32>
    %110 = arith.addf %104, %109 : vector<16x16xf32>
    %c0_65 = arith.constant 0 : index
    %c2_66 = arith.constant 2 : index
    %c2_67 = arith.constant 2 : index
    %111 = vector.load %arg4[%c0_65, %c2_66, %c2_67] : memref<2x22x22xf32, #tpu.memory_space<vmem>>, vector<1x16x16xf32>
    %112 = vector.shape_cast %111 : vector<1x16x16xf32> to vector<16x16xf32>
    %c16 = arith.constant 16 : index
    %113 = memref.load %arg1[%c16] : memref<98xf32, #tpu.memory_space<smem>>
    %114 = vector.broadcast %113 : f32 to vector<16x16xf32>
    %115 = arith.mulf %112, %114 : vector<16x16xf32>
    %116 = arith.addf %110, %115 : vector<16x16xf32>
    %c0_68 = arith.constant 0 : index
    %c2_69 = arith.constant 2 : index
    %c3_70 = arith.constant 3 : index
    %117 = vector.load %arg4[%c0_68, %c2_69, %c3_70] : memref<2x22x22xf32, #tpu.memory_space<vmem>>, vector<1x16x16xf32>
    %118 = vector.shape_cast %117 : vector<1x16x16xf32> to vector<16x16xf32>
    %c17 = arith.constant 17 : index
    %119 = memref.load %arg1[%c17] : memref<98xf32, #tpu.memory_space<smem>>
    %120 = vector.broadcast %119 : f32 to vector<16x16xf32>
    %121 = arith.mulf %118, %120 : vector<16x16xf32>
    %122 = arith.addf %116, %121 : vector<16x16xf32>
    %c0_71 = arith.constant 0 : index
    %c2_72 = arith.constant 2 : index
    %c4_73 = arith.constant 4 : index
    %123 = vector.load %arg4[%c0_71, %c2_72, %c4_73] : memref<2x22x22xf32, #tpu.memory_space<vmem>>, vector<1x16x16xf32>
    %124 = vector.shape_cast %123 : vector<1x16x16xf32> to vector<16x16xf32>
    %c18 = arith.constant 18 : index
    %125 = memref.load %arg1[%c18] : memref<98xf32, #tpu.memory_space<smem>>
    %126 = vector.broadcast %125 : f32 to vector<16x16xf32>
    %127 = arith.mulf %124, %126 : vector<16x16xf32>
    %128 = arith.addf %122, %127 : vector<16x16xf32>
    %c0_74 = arith.constant 0 : index
    %c2_75 = arith.constant 2 : index
    %c5_76 = arith.constant 5 : index
    %129 = vector.load %arg4[%c0_74, %c2_75, %c5_76] : memref<2x22x22xf32, #tpu.memory_space<vmem>>, vector<1x16x16xf32>
    %130 = vector.shape_cast %129 : vector<1x16x16xf32> to vector<16x16xf32>
    %c19 = arith.constant 19 : index
    %131 = memref.load %arg1[%c19] : memref<98xf32, #tpu.memory_space<smem>>
    %132 = vector.broadcast %131 : f32 to vector<16x16xf32>
    %133 = arith.mulf %130, %132 : vector<16x16xf32>
    %134 = arith.addf %128, %133 : vector<16x16xf32>
    %c0_77 = arith.constant 0 : index
    %c2_78 = arith.constant 2 : index
    %c6_79 = arith.constant 6 : index
    %135 = vector.load %arg4[%c0_77, %c2_78, %c6_79] : memref<2x22x22xf32, #tpu.memory_space<vmem>>, vector<1x16x16xf32>
    %136 = vector.shape_cast %135 : vector<1x16x16xf32> to vector<16x16xf32>
    %c20 = arith.constant 20 : index
    %137 = memref.load %arg1[%c20] : memref<98xf32, #tpu.memory_space<smem>>
    %138 = vector.broadcast %137 : f32 to vector<16x16xf32>
    %139 = arith.mulf %136, %138 : vector<16x16xf32>
    %140 = arith.addf %134, %139 : vector<16x16xf32>
    %c0_80 = arith.constant 0 : index
    %c3_81 = arith.constant 3 : index
    %c0_82 = arith.constant 0 : index
    %141 = vector.load %arg4[%c0_80, %c3_81, %c0_82] : memref<2x22x22xf32, #tpu.memory_space<vmem>>, vector<1x16x16xf32>
    %142 = vector.shape_cast %141 : vector<1x16x16xf32> to vector<16x16xf32>
    %c21 = arith.constant 21 : index
    %143 = memref.load %arg1[%c21] : memref<98xf32, #tpu.memory_space<smem>>
    %144 = vector.broadcast %143 : f32 to vector<16x16xf32>
    %145 = arith.mulf %142, %144 : vector<16x16xf32>
    %146 = arith.addf %140, %145 : vector<16x16xf32>
    %c0_83 = arith.constant 0 : index
    %c3_84 = arith.constant 3 : index
    %c1_85 = arith.constant 1 : index
    %147 = vector.load %arg4[%c0_83, %c3_84, %c1_85] : memref<2x22x22xf32, #tpu.memory_space<vmem>>, vector<1x16x16xf32>
    %148 = vector.shape_cast %147 : vector<1x16x16xf32> to vector<16x16xf32>
    %c22 = arith.constant 22 : index
    %149 = memref.load %arg1[%c22] : memref<98xf32, #tpu.memory_space<smem>>
    %150 = vector.broadcast %149 : f32 to vector<16x16xf32>
    %151 = arith.mulf %148, %150 : vector<16x16xf32>
    %152 = arith.addf %146, %151 : vector<16x16xf32>
    %c0_86 = arith.constant 0 : index
    %c3_87 = arith.constant 3 : index
    %c2_88 = arith.constant 2 : index
    %153 = vector.load %arg4[%c0_86, %c3_87, %c2_88] : memref<2x22x22xf32, #tpu.memory_space<vmem>>, vector<1x16x16xf32>
    %154 = vector.shape_cast %153 : vector<1x16x16xf32> to vector<16x16xf32>
    %c23 = arith.constant 23 : index
    %155 = memref.load %arg1[%c23] : memref<98xf32, #tpu.memory_space<smem>>
    %156 = vector.broadcast %155 : f32 to vector<16x16xf32>
    %157 = arith.mulf %154, %156 : vector<16x16xf32>
    %158 = arith.addf %152, %157 : vector<16x16xf32>
    %c0_89 = arith.constant 0 : index
    %c3_90 = arith.constant 3 : index
    %c3_91 = arith.constant 3 : index
    %159 = vector.load %arg4[%c0_89, %c3_90, %c3_91] : memref<2x22x22xf32, #tpu.memory_space<vmem>>, vector<1x16x16xf32>
    %160 = vector.shape_cast %159 : vector<1x16x16xf32> to vector<16x16xf32>
    %c24 = arith.constant 24 : index
    %161 = memref.load %arg1[%c24] : memref<98xf32, #tpu.memory_space<smem>>
    %162 = vector.broadcast %161 : f32 to vector<16x16xf32>
    %163 = arith.mulf %160, %162 : vector<16x16xf32>
    %164 = arith.addf %158, %163 : vector<16x16xf32>
    %c0_92 = arith.constant 0 : index
    %c3_93 = arith.constant 3 : index
    %c4_94 = arith.constant 4 : index
    %165 = vector.load %arg4[%c0_92, %c3_93, %c4_94] : memref<2x22x22xf32, #tpu.memory_space<vmem>>, vector<1x16x16xf32>
    %166 = vector.shape_cast %165 : vector<1x16x16xf32> to vector<16x16xf32>
    %c25 = arith.constant 25 : index
    %167 = memref.load %arg1[%c25] : memref<98xf32, #tpu.memory_space<smem>>
    %168 = vector.broadcast %167 : f32 to vector<16x16xf32>
    %169 = arith.mulf %166, %168 : vector<16x16xf32>
    %170 = arith.addf %164, %169 : vector<16x16xf32>
    %c0_95 = arith.constant 0 : index
    %c3_96 = arith.constant 3 : index
    %c5_97 = arith.constant 5 : index
    %171 = vector.load %arg4[%c0_95, %c3_96, %c5_97] : memref<2x22x22xf32, #tpu.memory_space<vmem>>, vector<1x16x16xf32>
    %172 = vector.shape_cast %171 : vector<1x16x16xf32> to vector<16x16xf32>
    %c26 = arith.constant 26 : index
    %173 = memref.load %arg1[%c26] : memref<98xf32, #tpu.memory_space<smem>>
    %174 = vector.broadcast %173 : f32 to vector<16x16xf32>
    %175 = arith.mulf %172, %174 : vector<16x16xf32>
    %176 = arith.addf %170, %175 : vector<16x16xf32>
    %c0_98 = arith.constant 0 : index
    %c3_99 = arith.constant 3 : index
    %c6_100 = arith.constant 6 : index
    %177 = vector.load %arg4[%c0_98, %c3_99, %c6_100] : memref<2x22x22xf32, #tpu.memory_space<vmem>>, vector<1x16x16xf32>
    %178 = vector.shape_cast %177 : vector<1x16x16xf32> to vector<16x16xf32>
    %c27 = arith.constant 27 : index
    %179 = memref.load %arg1[%c27] : memref<98xf32, #tpu.memory_space<smem>>
    %180 = vector.broadcast %179 : f32 to vector<16x16xf32>
    %181 = arith.mulf %178, %180 : vector<16x16xf32>
    %182 = arith.addf %176, %181 : vector<16x16xf32>
    %c0_101 = arith.constant 0 : index
    %c4_102 = arith.constant 4 : index
    %c0_103 = arith.constant 0 : index
    %183 = vector.load %arg4[%c0_101, %c4_102, %c0_103] : memref<2x22x22xf32, #tpu.memory_space<vmem>>, vector<1x16x16xf32>
    %184 = vector.shape_cast %183 : vector<1x16x16xf32> to vector<16x16xf32>
    %c28 = arith.constant 28 : index
    %185 = memref.load %arg1[%c28] : memref<98xf32, #tpu.memory_space<smem>>
    %186 = vector.broadcast %185 : f32 to vector<16x16xf32>
    %187 = arith.mulf %184, %186 : vector<16x16xf32>
    %188 = arith.addf %182, %187 : vector<16x16xf32>
    %c0_104 = arith.constant 0 : index
    %c4_105 = arith.constant 4 : index
    %c1_106 = arith.constant 1 : index
    %189 = vector.load %arg4[%c0_104, %c4_105, %c1_106] : memref<2x22x22xf32, #tpu.memory_space<vmem>>, vector<1x16x16xf32>
    %190 = vector.shape_cast %189 : vector<1x16x16xf32> to vector<16x16xf32>
    %c29 = arith.constant 29 : index
    %191 = memref.load %arg1[%c29] : memref<98xf32, #tpu.memory_space<smem>>
    %192 = vector.broadcast %191 : f32 to vector<16x16xf32>
    %193 = arith.mulf %190, %192 : vector<16x16xf32>
    %194 = arith.addf %188, %193 : vector<16x16xf32>
    %c0_107 = arith.constant 0 : index
    %c4_108 = arith.constant 4 : index
    %c2_109 = arith.constant 2 : index
    %195 = vector.load %arg4[%c0_107, %c4_108, %c2_109] : memref<2x22x22xf32, #tpu.memory_space<vmem>>, vector<1x16x16xf32>
    %196 = vector.shape_cast %195 : vector<1x16x16xf32> to vector<16x16xf32>
    %c30 = arith.constant 30 : index
    %197 = memref.load %arg1[%c30] : memref<98xf32, #tpu.memory_space<smem>>
    %198 = vector.broadcast %197 : f32 to vector<16x16xf32>
    %199 = arith.mulf %196, %198 : vector<16x16xf32>
    %200 = arith.addf %194, %199 : vector<16x16xf32>
    %c0_110 = arith.constant 0 : index
    %c4_111 = arith.constant 4 : index
    %c3_112 = arith.constant 3 : index
    %201 = vector.load %arg4[%c0_110, %c4_111, %c3_112] : memref<2x22x22xf32, #tpu.memory_space<vmem>>, vector<1x16x16xf32>
    %202 = vector.shape_cast %201 : vector<1x16x16xf32> to vector<16x16xf32>
    %c31 = arith.constant 31 : index
    %203 = memref.load %arg1[%c31] : memref<98xf32, #tpu.memory_space<smem>>
    %204 = vector.broadcast %203 : f32 to vector<16x16xf32>
    %205 = arith.mulf %202, %204 : vector<16x16xf32>
    %206 = arith.addf %200, %205 : vector<16x16xf32>
    %c0_113 = arith.constant 0 : index
    %c4_114 = arith.constant 4 : index
    %c4_115 = arith.constant 4 : index
    %207 = vector.load %arg4[%c0_113, %c4_114, %c4_115] : memref<2x22x22xf32, #tpu.memory_space<vmem>>, vector<1x16x16xf32>
    %208 = vector.shape_cast %207 : vector<1x16x16xf32> to vector<16x16xf32>
    %c32 = arith.constant 32 : index
    %209 = memref.load %arg1[%c32] : memref<98xf32, #tpu.memory_space<smem>>
    %210 = vector.broadcast %209 : f32 to vector<16x16xf32>
    %211 = arith.mulf %208, %210 : vector<16x16xf32>
    %212 = arith.addf %206, %211 : vector<16x16xf32>
    %c0_116 = arith.constant 0 : index
    %c4_117 = arith.constant 4 : index
    %c5_118 = arith.constant 5 : index
    %213 = vector.load %arg4[%c0_116, %c4_117, %c5_118] : memref<2x22x22xf32, #tpu.memory_space<vmem>>, vector<1x16x16xf32>
    %214 = vector.shape_cast %213 : vector<1x16x16xf32> to vector<16x16xf32>
    %c33 = arith.constant 33 : index
    %215 = memref.load %arg1[%c33] : memref<98xf32, #tpu.memory_space<smem>>
    %216 = vector.broadcast %215 : f32 to vector<16x16xf32>
    %217 = arith.mulf %214, %216 : vector<16x16xf32>
    %218 = arith.addf %212, %217 : vector<16x16xf32>
    %c0_119 = arith.constant 0 : index
    %c4_120 = arith.constant 4 : index
    %c6_121 = arith.constant 6 : index
    %219 = vector.load %arg4[%c0_119, %c4_120, %c6_121] : memref<2x22x22xf32, #tpu.memory_space<vmem>>, vector<1x16x16xf32>
    %220 = vector.shape_cast %219 : vector<1x16x16xf32> to vector<16x16xf32>
    %c34 = arith.constant 34 : index
    %221 = memref.load %arg1[%c34] : memref<98xf32, #tpu.memory_space<smem>>
    %222 = vector.broadcast %221 : f32 to vector<16x16xf32>
    %223 = arith.mulf %220, %222 : vector<16x16xf32>
    %224 = arith.addf %218, %223 : vector<16x16xf32>
    %c0_122 = arith.constant 0 : index
    %c5_123 = arith.constant 5 : index
    %c0_124 = arith.constant 0 : index
    %225 = vector.load %arg4[%c0_122, %c5_123, %c0_124] : memref<2x22x22xf32, #tpu.memory_space<vmem>>, vector<1x16x16xf32>
    %226 = vector.shape_cast %225 : vector<1x16x16xf32> to vector<16x16xf32>
    %c35 = arith.constant 35 : index
    %227 = memref.load %arg1[%c35] : memref<98xf32, #tpu.memory_space<smem>>
    %228 = vector.broadcast %227 : f32 to vector<16x16xf32>
    %229 = arith.mulf %226, %228 : vector<16x16xf32>
    %230 = arith.addf %224, %229 : vector<16x16xf32>
    %c0_125 = arith.constant 0 : index
    %c5_126 = arith.constant 5 : index
    %c1_127 = arith.constant 1 : index
    %231 = vector.load %arg4[%c0_125, %c5_126, %c1_127] : memref<2x22x22xf32, #tpu.memory_space<vmem>>, vector<1x16x16xf32>
    %232 = vector.shape_cast %231 : vector<1x16x16xf32> to vector<16x16xf32>
    %c36 = arith.constant 36 : index
    %233 = memref.load %arg1[%c36] : memref<98xf32, #tpu.memory_space<smem>>
    %234 = vector.broadcast %233 : f32 to vector<16x16xf32>
    %235 = arith.mulf %232, %234 : vector<16x16xf32>
    %236 = arith.addf %230, %235 : vector<16x16xf32>
    %c0_128 = arith.constant 0 : index
    %c5_129 = arith.constant 5 : index
    %c2_130 = arith.constant 2 : index
    %237 = vector.load %arg4[%c0_128, %c5_129, %c2_130] : memref<2x22x22xf32, #tpu.memory_space<vmem>>, vector<1x16x16xf32>
    %238 = vector.shape_cast %237 : vector<1x16x16xf32> to vector<16x16xf32>
    %c37 = arith.constant 37 : index
    %239 = memref.load %arg1[%c37] : memref<98xf32, #tpu.memory_space<smem>>
    %240 = vector.broadcast %239 : f32 to vector<16x16xf32>
    %241 = arith.mulf %238, %240 : vector<16x16xf32>
    %242 = arith.addf %236, %241 : vector<16x16xf32>
    %c0_131 = arith.constant 0 : index
    %c5_132 = arith.constant 5 : index
    %c3_133 = arith.constant 3 : index
    %243 = vector.load %arg4[%c0_131, %c5_132, %c3_133] : memref<2x22x22xf32, #tpu.memory_space<vmem>>, vector<1x16x16xf32>
    %244 = vector.shape_cast %243 : vector<1x16x16xf32> to vector<16x16xf32>
    %c38 = arith.constant 38 : index
    %245 = memref.load %arg1[%c38] : memref<98xf32, #tpu.memory_space<smem>>
    %246 = vector.broadcast %245 : f32 to vector<16x16xf32>
    %247 = arith.mulf %244, %246 : vector<16x16xf32>
    %248 = arith.addf %242, %247 : vector<16x16xf32>
    %c0_134 = arith.constant 0 : index
    %c5_135 = arith.constant 5 : index
    %c4_136 = arith.constant 4 : index
    %249 = vector.load %arg4[%c0_134, %c5_135, %c4_136] : memref<2x22x22xf32, #tpu.memory_space<vmem>>, vector<1x16x16xf32>
    %250 = vector.shape_cast %249 : vector<1x16x16xf32> to vector<16x16xf32>
    %c39 = arith.constant 39 : index
    %251 = memref.load %arg1[%c39] : memref<98xf32, #tpu.memory_space<smem>>
    %252 = vector.broadcast %251 : f32 to vector<16x16xf32>
    %253 = arith.mulf %250, %252 : vector<16x16xf32>
    %254 = arith.addf %248, %253 : vector<16x16xf32>
    %c0_137 = arith.constant 0 : index
    %c5_138 = arith.constant 5 : index
    %c5_139 = arith.constant 5 : index
    %255 = vector.load %arg4[%c0_137, %c5_138, %c5_139] : memref<2x22x22xf32, #tpu.memory_space<vmem>>, vector<1x16x16xf32>
    %256 = vector.shape_cast %255 : vector<1x16x16xf32> to vector<16x16xf32>
    %c40 = arith.constant 40 : index
    %257 = memref.load %arg1[%c40] : memref<98xf32, #tpu.memory_space<smem>>
    %258 = vector.broadcast %257 : f32 to vector<16x16xf32>
    %259 = arith.mulf %256, %258 : vector<16x16xf32>
    %260 = arith.addf %254, %259 : vector<16x16xf32>
    %c0_140 = arith.constant 0 : index
    %c5_141 = arith.constant 5 : index
    %c6_142 = arith.constant 6 : index
    %261 = vector.load %arg4[%c0_140, %c5_141, %c6_142] : memref<2x22x22xf32, #tpu.memory_space<vmem>>, vector<1x16x16xf32>
    %262 = vector.shape_cast %261 : vector<1x16x16xf32> to vector<16x16xf32>
    %c41 = arith.constant 41 : index
    %263 = memref.load %arg1[%c41] : memref<98xf32, #tpu.memory_space<smem>>
    %264 = vector.broadcast %263 : f32 to vector<16x16xf32>
    %265 = arith.mulf %262, %264 : vector<16x16xf32>
    %266 = arith.addf %260, %265 : vector<16x16xf32>
    %c0_143 = arith.constant 0 : index
    %c6_144 = arith.constant 6 : index
    %c0_145 = arith.constant 0 : index
    %267 = vector.load %arg4[%c0_143, %c6_144, %c0_145] : memref<2x22x22xf32, #tpu.memory_space<vmem>>, vector<1x16x16xf32>
    %268 = vector.shape_cast %267 : vector<1x16x16xf32> to vector<16x16xf32>
    %c42 = arith.constant 42 : index
    %269 = memref.load %arg1[%c42] : memref<98xf32, #tpu.memory_space<smem>>
    %270 = vector.broadcast %269 : f32 to vector<16x16xf32>
    %271 = arith.mulf %268, %270 : vector<16x16xf32>
    %272 = arith.addf %266, %271 : vector<16x16xf32>
    %c0_146 = arith.constant 0 : index
    %c6_147 = arith.constant 6 : index
    %c1_148 = arith.constant 1 : index
    %273 = vector.load %arg4[%c0_146, %c6_147, %c1_148] : memref<2x22x22xf32, #tpu.memory_space<vmem>>, vector<1x16x16xf32>
    %274 = vector.shape_cast %273 : vector<1x16x16xf32> to vector<16x16xf32>
    %c43 = arith.constant 43 : index
    %275 = memref.load %arg1[%c43] : memref<98xf32, #tpu.memory_space<smem>>
    %276 = vector.broadcast %275 : f32 to vector<16x16xf32>
    %277 = arith.mulf %274, %276 : vector<16x16xf32>
    %278 = arith.addf %272, %277 : vector<16x16xf32>
    %c0_149 = arith.constant 0 : index
    %c6_150 = arith.constant 6 : index
    %c2_151 = arith.constant 2 : index
    %279 = vector.load %arg4[%c0_149, %c6_150, %c2_151] : memref<2x22x22xf32, #tpu.memory_space<vmem>>, vector<1x16x16xf32>
    %280 = vector.shape_cast %279 : vector<1x16x16xf32> to vector<16x16xf32>
    %c44 = arith.constant 44 : index
    %281 = memref.load %arg1[%c44] : memref<98xf32, #tpu.memory_space<smem>>
    %282 = vector.broadcast %281 : f32 to vector<16x16xf32>
    %283 = arith.mulf %280, %282 : vector<16x16xf32>
    %284 = arith.addf %278, %283 : vector<16x16xf32>
    %c0_152 = arith.constant 0 : index
    %c6_153 = arith.constant 6 : index
    %c3_154 = arith.constant 3 : index
    %285 = vector.load %arg4[%c0_152, %c6_153, %c3_154] : memref<2x22x22xf32, #tpu.memory_space<vmem>>, vector<1x16x16xf32>
    %286 = vector.shape_cast %285 : vector<1x16x16xf32> to vector<16x16xf32>
    %c45 = arith.constant 45 : index
    %287 = memref.load %arg1[%c45] : memref<98xf32, #tpu.memory_space<smem>>
    %288 = vector.broadcast %287 : f32 to vector<16x16xf32>
    %289 = arith.mulf %286, %288 : vector<16x16xf32>
    %290 = arith.addf %284, %289 : vector<16x16xf32>
    %c0_155 = arith.constant 0 : index
    %c6_156 = arith.constant 6 : index
    %c4_157 = arith.constant 4 : index
    %291 = vector.load %arg4[%c0_155, %c6_156, %c4_157] : memref<2x22x22xf32, #tpu.memory_space<vmem>>, vector<1x16x16xf32>
    %292 = vector.shape_cast %291 : vector<1x16x16xf32> to vector<16x16xf32>
    %c46 = arith.constant 46 : index
    %293 = memref.load %arg1[%c46] : memref<98xf32, #tpu.memory_space<smem>>
    %294 = vector.broadcast %293 : f32 to vector<16x16xf32>
    %295 = arith.mulf %292, %294 : vector<16x16xf32>
    %296 = arith.addf %290, %295 : vector<16x16xf32>
    %c0_158 = arith.constant 0 : index
    %c6_159 = arith.constant 6 : index
    %c5_160 = arith.constant 5 : index
    %297 = vector.load %arg4[%c0_158, %c6_159, %c5_160] : memref<2x22x22xf32, #tpu.memory_space<vmem>>, vector<1x16x16xf32>
    %298 = vector.shape_cast %297 : vector<1x16x16xf32> to vector<16x16xf32>
    %c47 = arith.constant 47 : index
    %299 = memref.load %arg1[%c47] : memref<98xf32, #tpu.memory_space<smem>>
    %300 = vector.broadcast %299 : f32 to vector<16x16xf32>
    %301 = arith.mulf %298, %300 : vector<16x16xf32>
    %302 = arith.addf %296, %301 : vector<16x16xf32>
    %c0_161 = arith.constant 0 : index
    %c6_162 = arith.constant 6 : index
    %c6_163 = arith.constant 6 : index
    %303 = vector.load %arg4[%c0_161, %c6_162, %c6_163] : memref<2x22x22xf32, #tpu.memory_space<vmem>>, vector<1x16x16xf32>
    %304 = vector.shape_cast %303 : vector<1x16x16xf32> to vector<16x16xf32>
    %c48 = arith.constant 48 : index
    %305 = memref.load %arg1[%c48] : memref<98xf32, #tpu.memory_space<smem>>
    %306 = vector.broadcast %305 : f32 to vector<16x16xf32>
    %307 = arith.mulf %304, %306 : vector<16x16xf32>
    %308 = arith.addf %302, %307 : vector<16x16xf32>
    %c1_164 = arith.constant 1 : index
    %c0_165 = arith.constant 0 : index
    %c0_166 = arith.constant 0 : index
    %309 = vector.load %arg4[%c1_164, %c0_165, %c0_166] : memref<2x22x22xf32, #tpu.memory_space<vmem>>, vector<1x16x16xf32>
    %310 = vector.shape_cast %309 : vector<1x16x16xf32> to vector<16x16xf32>
    %c49 = arith.constant 49 : index
    %311 = memref.load %arg1[%c49] : memref<98xf32, #tpu.memory_space<smem>>
    %312 = vector.broadcast %311 : f32 to vector<16x16xf32>
    %313 = arith.mulf %310, %312 : vector<16x16xf32>
    %314 = arith.addf %308, %313 : vector<16x16xf32>
    %c1_167 = arith.constant 1 : index
    %c0_168 = arith.constant 0 : index
    %c1_169 = arith.constant 1 : index
    %315 = vector.load %arg4[%c1_167, %c0_168, %c1_169] : memref<2x22x22xf32, #tpu.memory_space<vmem>>, vector<1x16x16xf32>
    %316 = vector.shape_cast %315 : vector<1x16x16xf32> to vector<16x16xf32>
    %c50 = arith.constant 50 : index
    %317 = memref.load %arg1[%c50] : memref<98xf32, #tpu.memory_space<smem>>
    %318 = vector.broadcast %317 : f32 to vector<16x16xf32>
    %319 = arith.mulf %316, %318 : vector<16x16xf32>
    %320 = arith.addf %314, %319 : vector<16x16xf32>
    %c1_170 = arith.constant 1 : index
    %c0_171 = arith.constant 0 : index
    %c2_172 = arith.constant 2 : index
    %321 = vector.load %arg4[%c1_170, %c0_171, %c2_172] : memref<2x22x22xf32, #tpu.memory_space<vmem>>, vector<1x16x16xf32>
    %322 = vector.shape_cast %321 : vector<1x16x16xf32> to vector<16x16xf32>
    %c51 = arith.constant 51 : index
    %323 = memref.load %arg1[%c51] : memref<98xf32, #tpu.memory_space<smem>>
    %324 = vector.broadcast %323 : f32 to vector<16x16xf32>
    %325 = arith.mulf %322, %324 : vector<16x16xf32>
    %326 = arith.addf %320, %325 : vector<16x16xf32>
    %c1_173 = arith.constant 1 : index
    %c0_174 = arith.constant 0 : index
    %c3_175 = arith.constant 3 : index
    %327 = vector.load %arg4[%c1_173, %c0_174, %c3_175] : memref<2x22x22xf32, #tpu.memory_space<vmem>>, vector<1x16x16xf32>
    %328 = vector.shape_cast %327 : vector<1x16x16xf32> to vector<16x16xf32>
    %c52 = arith.constant 52 : index
    %329 = memref.load %arg1[%c52] : memref<98xf32, #tpu.memory_space<smem>>
    %330 = vector.broadcast %329 : f32 to vector<16x16xf32>
    %331 = arith.mulf %328, %330 : vector<16x16xf32>
    %332 = arith.addf %326, %331 : vector<16x16xf32>
    %c1_176 = arith.constant 1 : index
    %c0_177 = arith.constant 0 : index
    %c4_178 = arith.constant 4 : index
    %333 = vector.load %arg4[%c1_176, %c0_177, %c4_178] : memref<2x22x22xf32, #tpu.memory_space<vmem>>, vector<1x16x16xf32>
    %334 = vector.shape_cast %333 : vector<1x16x16xf32> to vector<16x16xf32>
    %c53 = arith.constant 53 : index
    %335 = memref.load %arg1[%c53] : memref<98xf32, #tpu.memory_space<smem>>
    %336 = vector.broadcast %335 : f32 to vector<16x16xf32>
    %337 = arith.mulf %334, %336 : vector<16x16xf32>
    %338 = arith.addf %332, %337 : vector<16x16xf32>
    %c1_179 = arith.constant 1 : index
    %c0_180 = arith.constant 0 : index
    %c5_181 = arith.constant 5 : index
    %339 = vector.load %arg4[%c1_179, %c0_180, %c5_181] : memref<2x22x22xf32, #tpu.memory_space<vmem>>, vector<1x16x16xf32>
    %340 = vector.shape_cast %339 : vector<1x16x16xf32> to vector<16x16xf32>
    %c54 = arith.constant 54 : index
    %341 = memref.load %arg1[%c54] : memref<98xf32, #tpu.memory_space<smem>>
    %342 = vector.broadcast %341 : f32 to vector<16x16xf32>
    %343 = arith.mulf %340, %342 : vector<16x16xf32>
    %344 = arith.addf %338, %343 : vector<16x16xf32>
    %c1_182 = arith.constant 1 : index
    %c0_183 = arith.constant 0 : index
    %c6_184 = arith.constant 6 : index
    %345 = vector.load %arg4[%c1_182, %c0_183, %c6_184] : memref<2x22x22xf32, #tpu.memory_space<vmem>>, vector<1x16x16xf32>
    %346 = vector.shape_cast %345 : vector<1x16x16xf32> to vector<16x16xf32>
    %c55 = arith.constant 55 : index
    %347 = memref.load %arg1[%c55] : memref<98xf32, #tpu.memory_space<smem>>
    %348 = vector.broadcast %347 : f32 to vector<16x16xf32>
    %349 = arith.mulf %346, %348 : vector<16x16xf32>
    %350 = arith.addf %344, %349 : vector<16x16xf32>
    %c1_185 = arith.constant 1 : index
    %c1_186 = arith.constant 1 : index
    %c0_187 = arith.constant 0 : index
    %351 = vector.load %arg4[%c1_185, %c1_186, %c0_187] : memref<2x22x22xf32, #tpu.memory_space<vmem>>, vector<1x16x16xf32>
    %352 = vector.shape_cast %351 : vector<1x16x16xf32> to vector<16x16xf32>
    %c56 = arith.constant 56 : index
    %353 = memref.load %arg1[%c56] : memref<98xf32, #tpu.memory_space<smem>>
    %354 = vector.broadcast %353 : f32 to vector<16x16xf32>
    %355 = arith.mulf %352, %354 : vector<16x16xf32>
    %356 = arith.addf %350, %355 : vector<16x16xf32>
    %c1_188 = arith.constant 1 : index
    %c1_189 = arith.constant 1 : index
    %c1_190 = arith.constant 1 : index
    %357 = vector.load %arg4[%c1_188, %c1_189, %c1_190] : memref<2x22x22xf32, #tpu.memory_space<vmem>>, vector<1x16x16xf32>
    %358 = vector.shape_cast %357 : vector<1x16x16xf32> to vector<16x16xf32>
    %c57 = arith.constant 57 : index
    %359 = memref.load %arg1[%c57] : memref<98xf32, #tpu.memory_space<smem>>
    %360 = vector.broadcast %359 : f32 to vector<16x16xf32>
    %361 = arith.mulf %358, %360 : vector<16x16xf32>
    %362 = arith.addf %356, %361 : vector<16x16xf32>
    %c1_191 = arith.constant 1 : index
    %c1_192 = arith.constant 1 : index
    %c2_193 = arith.constant 2 : index
    %363 = vector.load %arg4[%c1_191, %c1_192, %c2_193] : memref<2x22x22xf32, #tpu.memory_space<vmem>>, vector<1x16x16xf32>
    %364 = vector.shape_cast %363 : vector<1x16x16xf32> to vector<16x16xf32>
    %c58 = arith.constant 58 : index
    %365 = memref.load %arg1[%c58] : memref<98xf32, #tpu.memory_space<smem>>
    %366 = vector.broadcast %365 : f32 to vector<16x16xf32>
    %367 = arith.mulf %364, %366 : vector<16x16xf32>
    %368 = arith.addf %362, %367 : vector<16x16xf32>
    %c1_194 = arith.constant 1 : index
    %c1_195 = arith.constant 1 : index
    %c3_196 = arith.constant 3 : index
    %369 = vector.load %arg4[%c1_194, %c1_195, %c3_196] : memref<2x22x22xf32, #tpu.memory_space<vmem>>, vector<1x16x16xf32>
    %370 = vector.shape_cast %369 : vector<1x16x16xf32> to vector<16x16xf32>
    %c59 = arith.constant 59 : index
    %371 = memref.load %arg1[%c59] : memref<98xf32, #tpu.memory_space<smem>>
    %372 = vector.broadcast %371 : f32 to vector<16x16xf32>
    %373 = arith.mulf %370, %372 : vector<16x16xf32>
    %374 = arith.addf %368, %373 : vector<16x16xf32>
    %c1_197 = arith.constant 1 : index
    %c1_198 = arith.constant 1 : index
    %c4_199 = arith.constant 4 : index
    %375 = vector.load %arg4[%c1_197, %c1_198, %c4_199] : memref<2x22x22xf32, #tpu.memory_space<vmem>>, vector<1x16x16xf32>
    %376 = vector.shape_cast %375 : vector<1x16x16xf32> to vector<16x16xf32>
    %c60 = arith.constant 60 : index
    %377 = memref.load %arg1[%c60] : memref<98xf32, #tpu.memory_space<smem>>
    %378 = vector.broadcast %377 : f32 to vector<16x16xf32>
    %379 = arith.mulf %376, %378 : vector<16x16xf32>
    %380 = arith.addf %374, %379 : vector<16x16xf32>
    %c1_200 = arith.constant 1 : index
    %c1_201 = arith.constant 1 : index
    %c5_202 = arith.constant 5 : index
    %381 = vector.load %arg4[%c1_200, %c1_201, %c5_202] : memref<2x22x22xf32, #tpu.memory_space<vmem>>, vector<1x16x16xf32>
    %382 = vector.shape_cast %381 : vector<1x16x16xf32> to vector<16x16xf32>
    %c61 = arith.constant 61 : index
    %383 = memref.load %arg1[%c61] : memref<98xf32, #tpu.memory_space<smem>>
    %384 = vector.broadcast %383 : f32 to vector<16x16xf32>
    %385 = arith.mulf %382, %384 : vector<16x16xf32>
    %386 = arith.addf %380, %385 : vector<16x16xf32>
    %c1_203 = arith.constant 1 : index
    %c1_204 = arith.constant 1 : index
    %c6_205 = arith.constant 6 : index
    %387 = vector.load %arg4[%c1_203, %c1_204, %c6_205] : memref<2x22x22xf32, #tpu.memory_space<vmem>>, vector<1x16x16xf32>
    %388 = vector.shape_cast %387 : vector<1x16x16xf32> to vector<16x16xf32>
    %c62 = arith.constant 62 : index
    %389 = memref.load %arg1[%c62] : memref<98xf32, #tpu.memory_space<smem>>
    %390 = vector.broadcast %389 : f32 to vector<16x16xf32>
    %391 = arith.mulf %388, %390 : vector<16x16xf32>
    %392 = arith.addf %386, %391 : vector<16x16xf32>
    %c1_206 = arith.constant 1 : index
    %c2_207 = arith.constant 2 : index
    %c0_208 = arith.constant 0 : index
    %393 = vector.load %arg4[%c1_206, %c2_207, %c0_208] : memref<2x22x22xf32, #tpu.memory_space<vmem>>, vector<1x16x16xf32>
    %394 = vector.shape_cast %393 : vector<1x16x16xf32> to vector<16x16xf32>
    %c63 = arith.constant 63 : index
    %395 = memref.load %arg1[%c63] : memref<98xf32, #tpu.memory_space<smem>>
    %396 = vector.broadcast %395 : f32 to vector<16x16xf32>
    %397 = arith.mulf %394, %396 : vector<16x16xf32>
    %398 = arith.addf %392, %397 : vector<16x16xf32>
    %c1_209 = arith.constant 1 : index
    %c2_210 = arith.constant 2 : index
    %c1_211 = arith.constant 1 : index
    %399 = vector.load %arg4[%c1_209, %c2_210, %c1_211] : memref<2x22x22xf32, #tpu.memory_space<vmem>>, vector<1x16x16xf32>
    %400 = vector.shape_cast %399 : vector<1x16x16xf32> to vector<16x16xf32>
    %c64 = arith.constant 64 : index
    %401 = memref.load %arg1[%c64] : memref<98xf32, #tpu.memory_space<smem>>
    %402 = vector.broadcast %401 : f32 to vector<16x16xf32>
    %403 = arith.mulf %400, %402 : vector<16x16xf32>
    %404 = arith.addf %398, %403 : vector<16x16xf32>
    %c1_212 = arith.constant 1 : index
    %c2_213 = arith.constant 2 : index
    %c2_214 = arith.constant 2 : index
    %405 = vector.load %arg4[%c1_212, %c2_213, %c2_214] : memref<2x22x22xf32, #tpu.memory_space<vmem>>, vector<1x16x16xf32>
    %406 = vector.shape_cast %405 : vector<1x16x16xf32> to vector<16x16xf32>
    %c65 = arith.constant 65 : index
    %407 = memref.load %arg1[%c65] : memref<98xf32, #tpu.memory_space<smem>>
    %408 = vector.broadcast %407 : f32 to vector<16x16xf32>
    %409 = arith.mulf %406, %408 : vector<16x16xf32>
    %410 = arith.addf %404, %409 : vector<16x16xf32>
    %c1_215 = arith.constant 1 : index
    %c2_216 = arith.constant 2 : index
    %c3_217 = arith.constant 3 : index
    %411 = vector.load %arg4[%c1_215, %c2_216, %c3_217] : memref<2x22x22xf32, #tpu.memory_space<vmem>>, vector<1x16x16xf32>
    %412 = vector.shape_cast %411 : vector<1x16x16xf32> to vector<16x16xf32>
    %c66 = arith.constant 66 : index
    %413 = memref.load %arg1[%c66] : memref<98xf32, #tpu.memory_space<smem>>
    %414 = vector.broadcast %413 : f32 to vector<16x16xf32>
    %415 = arith.mulf %412, %414 : vector<16x16xf32>
    %416 = arith.addf %410, %415 : vector<16x16xf32>
    %c1_218 = arith.constant 1 : index
    %c2_219 = arith.constant 2 : index
    %c4_220 = arith.constant 4 : index
    %417 = vector.load %arg4[%c1_218, %c2_219, %c4_220] : memref<2x22x22xf32, #tpu.memory_space<vmem>>, vector<1x16x16xf32>
    %418 = vector.shape_cast %417 : vector<1x16x16xf32> to vector<16x16xf32>
    %c67 = arith.constant 67 : index
    %419 = memref.load %arg1[%c67] : memref<98xf32, #tpu.memory_space<smem>>
    %420 = vector.broadcast %419 : f32 to vector<16x16xf32>
    %421 = arith.mulf %418, %420 : vector<16x16xf32>
    %422 = arith.addf %416, %421 : vector<16x16xf32>
    %c1_221 = arith.constant 1 : index
    %c2_222 = arith.constant 2 : index
    %c5_223 = arith.constant 5 : index
    %423 = vector.load %arg4[%c1_221, %c2_222, %c5_223] : memref<2x22x22xf32, #tpu.memory_space<vmem>>, vector<1x16x16xf32>
    %424 = vector.shape_cast %423 : vector<1x16x16xf32> to vector<16x16xf32>
    %c68 = arith.constant 68 : index
    %425 = memref.load %arg1[%c68] : memref<98xf32, #tpu.memory_space<smem>>
    %426 = vector.broadcast %425 : f32 to vector<16x16xf32>
    %427 = arith.mulf %424, %426 : vector<16x16xf32>
    %428 = arith.addf %422, %427 : vector<16x16xf32>
    %c1_224 = arith.constant 1 : index
    %c2_225 = arith.constant 2 : index
    %c6_226 = arith.constant 6 : index
    %429 = vector.load %arg4[%c1_224, %c2_225, %c6_226] : memref<2x22x22xf32, #tpu.memory_space<vmem>>, vector<1x16x16xf32>
    %430 = vector.shape_cast %429 : vector<1x16x16xf32> to vector<16x16xf32>
    %c69 = arith.constant 69 : index
    %431 = memref.load %arg1[%c69] : memref<98xf32, #tpu.memory_space<smem>>
    %432 = vector.broadcast %431 : f32 to vector<16x16xf32>
    %433 = arith.mulf %430, %432 : vector<16x16xf32>
    %434 = arith.addf %428, %433 : vector<16x16xf32>
    %c1_227 = arith.constant 1 : index
    %c3_228 = arith.constant 3 : index
    %c0_229 = arith.constant 0 : index
    %435 = vector.load %arg4[%c1_227, %c3_228, %c0_229] : memref<2x22x22xf32, #tpu.memory_space<vmem>>, vector<1x16x16xf32>
    %436 = vector.shape_cast %435 : vector<1x16x16xf32> to vector<16x16xf32>
    %c70 = arith.constant 70 : index
    %437 = memref.load %arg1[%c70] : memref<98xf32, #tpu.memory_space<smem>>
    %438 = vector.broadcast %437 : f32 to vector<16x16xf32>
    %439 = arith.mulf %436, %438 : vector<16x16xf32>
    %440 = arith.addf %434, %439 : vector<16x16xf32>
    %c1_230 = arith.constant 1 : index
    %c3_231 = arith.constant 3 : index
    %c1_232 = arith.constant 1 : index
    %441 = vector.load %arg4[%c1_230, %c3_231, %c1_232] : memref<2x22x22xf32, #tpu.memory_space<vmem>>, vector<1x16x16xf32>
    %442 = vector.shape_cast %441 : vector<1x16x16xf32> to vector<16x16xf32>
    %c71 = arith.constant 71 : index
    %443 = memref.load %arg1[%c71] : memref<98xf32, #tpu.memory_space<smem>>
    %444 = vector.broadcast %443 : f32 to vector<16x16xf32>
    %445 = arith.mulf %442, %444 : vector<16x16xf32>
    %446 = arith.addf %440, %445 : vector<16x16xf32>
    %c1_233 = arith.constant 1 : index
    %c3_234 = arith.constant 3 : index
    %c2_235 = arith.constant 2 : index
    %447 = vector.load %arg4[%c1_233, %c3_234, %c2_235] : memref<2x22x22xf32, #tpu.memory_space<vmem>>, vector<1x16x16xf32>
    %448 = vector.shape_cast %447 : vector<1x16x16xf32> to vector<16x16xf32>
    %c72 = arith.constant 72 : index
    %449 = memref.load %arg1[%c72] : memref<98xf32, #tpu.memory_space<smem>>
    %450 = vector.broadcast %449 : f32 to vector<16x16xf32>
    %451 = arith.mulf %448, %450 : vector<16x16xf32>
    %452 = arith.addf %446, %451 : vector<16x16xf32>
    %c1_236 = arith.constant 1 : index
    %c3_237 = arith.constant 3 : index
    %c3_238 = arith.constant 3 : index
    %453 = vector.load %arg4[%c1_236, %c3_237, %c3_238] : memref<2x22x22xf32, #tpu.memory_space<vmem>>, vector<1x16x16xf32>
    %454 = vector.shape_cast %453 : vector<1x16x16xf32> to vector<16x16xf32>
    %c73 = arith.constant 73 : index
    %455 = memref.load %arg1[%c73] : memref<98xf32, #tpu.memory_space<smem>>
    %456 = vector.broadcast %455 : f32 to vector<16x16xf32>
    %457 = arith.mulf %454, %456 : vector<16x16xf32>
    %458 = arith.addf %452, %457 : vector<16x16xf32>
    %c1_239 = arith.constant 1 : index
    %c3_240 = arith.constant 3 : index
    %c4_241 = arith.constant 4 : index
    %459 = vector.load %arg4[%c1_239, %c3_240, %c4_241] : memref<2x22x22xf32, #tpu.memory_space<vmem>>, vector<1x16x16xf32>
    %460 = vector.shape_cast %459 : vector<1x16x16xf32> to vector<16x16xf32>
    %c74 = arith.constant 74 : index
    %461 = memref.load %arg1[%c74] : memref<98xf32, #tpu.memory_space<smem>>
    %462 = vector.broadcast %461 : f32 to vector<16x16xf32>
    %463 = arith.mulf %460, %462 : vector<16x16xf32>
    %464 = arith.addf %458, %463 : vector<16x16xf32>
    %c1_242 = arith.constant 1 : index
    %c3_243 = arith.constant 3 : index
    %c5_244 = arith.constant 5 : index
    %465 = vector.load %arg4[%c1_242, %c3_243, %c5_244] : memref<2x22x22xf32, #tpu.memory_space<vmem>>, vector<1x16x16xf32>
    %466 = vector.shape_cast %465 : vector<1x16x16xf32> to vector<16x16xf32>
    %c75 = arith.constant 75 : index
    %467 = memref.load %arg1[%c75] : memref<98xf32, #tpu.memory_space<smem>>
    %468 = vector.broadcast %467 : f32 to vector<16x16xf32>
    %469 = arith.mulf %466, %468 : vector<16x16xf32>
    %470 = arith.addf %464, %469 : vector<16x16xf32>
    %c1_245 = arith.constant 1 : index
    %c3_246 = arith.constant 3 : index
    %c6_247 = arith.constant 6 : index
    %471 = vector.load %arg4[%c1_245, %c3_246, %c6_247] : memref<2x22x22xf32, #tpu.memory_space<vmem>>, vector<1x16x16xf32>
    %472 = vector.shape_cast %471 : vector<1x16x16xf32> to vector<16x16xf32>
    %c76 = arith.constant 76 : index
    %473 = memref.load %arg1[%c76] : memref<98xf32, #tpu.memory_space<smem>>
    %474 = vector.broadcast %473 : f32 to vector<16x16xf32>
    %475 = arith.mulf %472, %474 : vector<16x16xf32>
    %476 = arith.addf %470, %475 : vector<16x16xf32>
    %c1_248 = arith.constant 1 : index
    %c4_249 = arith.constant 4 : index
    %c0_250 = arith.constant 0 : index
    %477 = vector.load %arg4[%c1_248, %c4_249, %c0_250] : memref<2x22x22xf32, #tpu.memory_space<vmem>>, vector<1x16x16xf32>
    %478 = vector.shape_cast %477 : vector<1x16x16xf32> to vector<16x16xf32>
    %c77 = arith.constant 77 : index
    %479 = memref.load %arg1[%c77] : memref<98xf32, #tpu.memory_space<smem>>
    %480 = vector.broadcast %479 : f32 to vector<16x16xf32>
    %481 = arith.mulf %478, %480 : vector<16x16xf32>
    %482 = arith.addf %476, %481 : vector<16x16xf32>
    %c1_251 = arith.constant 1 : index
    %c4_252 = arith.constant 4 : index
    %c1_253 = arith.constant 1 : index
    %483 = vector.load %arg4[%c1_251, %c4_252, %c1_253] : memref<2x22x22xf32, #tpu.memory_space<vmem>>, vector<1x16x16xf32>
    %484 = vector.shape_cast %483 : vector<1x16x16xf32> to vector<16x16xf32>
    %c78 = arith.constant 78 : index
    %485 = memref.load %arg1[%c78] : memref<98xf32, #tpu.memory_space<smem>>
    %486 = vector.broadcast %485 : f32 to vector<16x16xf32>
    %487 = arith.mulf %484, %486 : vector<16x16xf32>
    %488 = arith.addf %482, %487 : vector<16x16xf32>
    %c1_254 = arith.constant 1 : index
    %c4_255 = arith.constant 4 : index
    %c2_256 = arith.constant 2 : index
    %489 = vector.load %arg4[%c1_254, %c4_255, %c2_256] : memref<2x22x22xf32, #tpu.memory_space<vmem>>, vector<1x16x16xf32>
    %490 = vector.shape_cast %489 : vector<1x16x16xf32> to vector<16x16xf32>
    %c79 = arith.constant 79 : index
    %491 = memref.load %arg1[%c79] : memref<98xf32, #tpu.memory_space<smem>>
    %492 = vector.broadcast %491 : f32 to vector<16x16xf32>
    %493 = arith.mulf %490, %492 : vector<16x16xf32>
    %494 = arith.addf %488, %493 : vector<16x16xf32>
    %c1_257 = arith.constant 1 : index
    %c4_258 = arith.constant 4 : index
    %c3_259 = arith.constant 3 : index
    %495 = vector.load %arg4[%c1_257, %c4_258, %c3_259] : memref<2x22x22xf32, #tpu.memory_space<vmem>>, vector<1x16x16xf32>
    %496 = vector.shape_cast %495 : vector<1x16x16xf32> to vector<16x16xf32>
    %c80 = arith.constant 80 : index
    %497 = memref.load %arg1[%c80] : memref<98xf32, #tpu.memory_space<smem>>
    %498 = vector.broadcast %497 : f32 to vector<16x16xf32>
    %499 = arith.mulf %496, %498 : vector<16x16xf32>
    %500 = arith.addf %494, %499 : vector<16x16xf32>
    %c1_260 = arith.constant 1 : index
    %c4_261 = arith.constant 4 : index
    %c4_262 = arith.constant 4 : index
    %501 = vector.load %arg4[%c1_260, %c4_261, %c4_262] : memref<2x22x22xf32, #tpu.memory_space<vmem>>, vector<1x16x16xf32>
    %502 = vector.shape_cast %501 : vector<1x16x16xf32> to vector<16x16xf32>
    %c81 = arith.constant 81 : index
    %503 = memref.load %arg1[%c81] : memref<98xf32, #tpu.memory_space<smem>>
    %504 = vector.broadcast %503 : f32 to vector<16x16xf32>
    %505 = arith.mulf %502, %504 : vector<16x16xf32>
    %506 = arith.addf %500, %505 : vector<16x16xf32>
    %c1_263 = arith.constant 1 : index
    %c4_264 = arith.constant 4 : index
    %c5_265 = arith.constant 5 : index
    %507 = vector.load %arg4[%c1_263, %c4_264, %c5_265] : memref<2x22x22xf32, #tpu.memory_space<vmem>>, vector<1x16x16xf32>
    %508 = vector.shape_cast %507 : vector<1x16x16xf32> to vector<16x16xf32>
    %c82 = arith.constant 82 : index
    %509 = memref.load %arg1[%c82] : memref<98xf32, #tpu.memory_space<smem>>
    %510 = vector.broadcast %509 : f32 to vector<16x16xf32>
    %511 = arith.mulf %508, %510 : vector<16x16xf32>
    %512 = arith.addf %506, %511 : vector<16x16xf32>
    %c1_266 = arith.constant 1 : index
    %c4_267 = arith.constant 4 : index
    %c6_268 = arith.constant 6 : index
    %513 = vector.load %arg4[%c1_266, %c4_267, %c6_268] : memref<2x22x22xf32, #tpu.memory_space<vmem>>, vector<1x16x16xf32>
    %514 = vector.shape_cast %513 : vector<1x16x16xf32> to vector<16x16xf32>
    %c83 = arith.constant 83 : index
    %515 = memref.load %arg1[%c83] : memref<98xf32, #tpu.memory_space<smem>>
    %516 = vector.broadcast %515 : f32 to vector<16x16xf32>
    %517 = arith.mulf %514, %516 : vector<16x16xf32>
    %518 = arith.addf %512, %517 : vector<16x16xf32>
    %c1_269 = arith.constant 1 : index
    %c5_270 = arith.constant 5 : index
    %c0_271 = arith.constant 0 : index
    %519 = vector.load %arg4[%c1_269, %c5_270, %c0_271] : memref<2x22x22xf32, #tpu.memory_space<vmem>>, vector<1x16x16xf32>
    %520 = vector.shape_cast %519 : vector<1x16x16xf32> to vector<16x16xf32>
    %c84 = arith.constant 84 : index
    %521 = memref.load %arg1[%c84] : memref<98xf32, #tpu.memory_space<smem>>
    %522 = vector.broadcast %521 : f32 to vector<16x16xf32>
    %523 = arith.mulf %520, %522 : vector<16x16xf32>
    %524 = arith.addf %518, %523 : vector<16x16xf32>
    %c1_272 = arith.constant 1 : index
    %c5_273 = arith.constant 5 : index
    %c1_274 = arith.constant 1 : index
    %525 = vector.load %arg4[%c1_272, %c5_273, %c1_274] : memref<2x22x22xf32, #tpu.memory_space<vmem>>, vector<1x16x16xf32>
    %526 = vector.shape_cast %525 : vector<1x16x16xf32> to vector<16x16xf32>
    %c85 = arith.constant 85 : index
    %527 = memref.load %arg1[%c85] : memref<98xf32, #tpu.memory_space<smem>>
    %528 = vector.broadcast %527 : f32 to vector<16x16xf32>
    %529 = arith.mulf %526, %528 : vector<16x16xf32>
    %530 = arith.addf %524, %529 : vector<16x16xf32>
    %c1_275 = arith.constant 1 : index
    %c5_276 = arith.constant 5 : index
    %c2_277 = arith.constant 2 : index
    %531 = vector.load %arg4[%c1_275, %c5_276, %c2_277] : memref<2x22x22xf32, #tpu.memory_space<vmem>>, vector<1x16x16xf32>
    %532 = vector.shape_cast %531 : vector<1x16x16xf32> to vector<16x16xf32>
    %c86 = arith.constant 86 : index
    %533 = memref.load %arg1[%c86] : memref<98xf32, #tpu.memory_space<smem>>
    %534 = vector.broadcast %533 : f32 to vector<16x16xf32>
    %535 = arith.mulf %532, %534 : vector<16x16xf32>
    %536 = arith.addf %530, %535 : vector<16x16xf32>
    %c1_278 = arith.constant 1 : index
    %c5_279 = arith.constant 5 : index
    %c3_280 = arith.constant 3 : index
    %537 = vector.load %arg4[%c1_278, %c5_279, %c3_280] : memref<2x22x22xf32, #tpu.memory_space<vmem>>, vector<1x16x16xf32>
    %538 = vector.shape_cast %537 : vector<1x16x16xf32> to vector<16x16xf32>
    %c87 = arith.constant 87 : index
    %539 = memref.load %arg1[%c87] : memref<98xf32, #tpu.memory_space<smem>>
    %540 = vector.broadcast %539 : f32 to vector<16x16xf32>
    %541 = arith.mulf %538, %540 : vector<16x16xf32>
    %542 = arith.addf %536, %541 : vector<16x16xf32>
    %c1_281 = arith.constant 1 : index
    %c5_282 = arith.constant 5 : index
    %c4_283 = arith.constant 4 : index
    %543 = vector.load %arg4[%c1_281, %c5_282, %c4_283] : memref<2x22x22xf32, #tpu.memory_space<vmem>>, vector<1x16x16xf32>
    %544 = vector.shape_cast %543 : vector<1x16x16xf32> to vector<16x16xf32>
    %c88 = arith.constant 88 : index
    %545 = memref.load %arg1[%c88] : memref<98xf32, #tpu.memory_space<smem>>
    %546 = vector.broadcast %545 : f32 to vector<16x16xf32>
    %547 = arith.mulf %544, %546 : vector<16x16xf32>
    %548 = arith.addf %542, %547 : vector<16x16xf32>
    %c1_284 = arith.constant 1 : index
    %c5_285 = arith.constant 5 : index
    %c5_286 = arith.constant 5 : index
    %549 = vector.load %arg4[%c1_284, %c5_285, %c5_286] : memref<2x22x22xf32, #tpu.memory_space<vmem>>, vector<1x16x16xf32>
    %550 = vector.shape_cast %549 : vector<1x16x16xf32> to vector<16x16xf32>
    %c89 = arith.constant 89 : index
    %551 = memref.load %arg1[%c89] : memref<98xf32, #tpu.memory_space<smem>>
    %552 = vector.broadcast %551 : f32 to vector<16x16xf32>
    %553 = arith.mulf %550, %552 : vector<16x16xf32>
    %554 = arith.addf %548, %553 : vector<16x16xf32>
    %c1_287 = arith.constant 1 : index
    %c5_288 = arith.constant 5 : index
    %c6_289 = arith.constant 6 : index
    %555 = vector.load %arg4[%c1_287, %c5_288, %c6_289] : memref<2x22x22xf32, #tpu.memory_space<vmem>>, vector<1x16x16xf32>
    %556 = vector.shape_cast %555 : vector<1x16x16xf32> to vector<16x16xf32>
    %c90 = arith.constant 90 : index
    %557 = memref.load %arg1[%c90] : memref<98xf32, #tpu.memory_space<smem>>
    %558 = vector.broadcast %557 : f32 to vector<16x16xf32>
    %559 = arith.mulf %556, %558 : vector<16x16xf32>
    %560 = arith.addf %554, %559 : vector<16x16xf32>
    %c1_290 = arith.constant 1 : index
    %c6_291 = arith.constant 6 : index
    %c0_292 = arith.constant 0 : index
    %561 = vector.load %arg4[%c1_290, %c6_291, %c0_292] : memref<2x22x22xf32, #tpu.memory_space<vmem>>, vector<1x16x16xf32>
    %562 = vector.shape_cast %561 : vector<1x16x16xf32> to vector<16x16xf32>
    %c91 = arith.constant 91 : index
    %563 = memref.load %arg1[%c91] : memref<98xf32, #tpu.memory_space<smem>>
    %564 = vector.broadcast %563 : f32 to vector<16x16xf32>
    %565 = arith.mulf %562, %564 : vector<16x16xf32>
    %566 = arith.addf %560, %565 : vector<16x16xf32>
    %c1_293 = arith.constant 1 : index
    %c6_294 = arith.constant 6 : index
    %c1_295 = arith.constant 1 : index
    %567 = vector.load %arg4[%c1_293, %c6_294, %c1_295] : memref<2x22x22xf32, #tpu.memory_space<vmem>>, vector<1x16x16xf32>
    %568 = vector.shape_cast %567 : vector<1x16x16xf32> to vector<16x16xf32>
    %c92 = arith.constant 92 : index
    %569 = memref.load %arg1[%c92] : memref<98xf32, #tpu.memory_space<smem>>
    %570 = vector.broadcast %569 : f32 to vector<16x16xf32>
    %571 = arith.mulf %568, %570 : vector<16x16xf32>
    %572 = arith.addf %566, %571 : vector<16x16xf32>
    %c1_296 = arith.constant 1 : index
    %c6_297 = arith.constant 6 : index
    %c2_298 = arith.constant 2 : index
    %573 = vector.load %arg4[%c1_296, %c6_297, %c2_298] : memref<2x22x22xf32, #tpu.memory_space<vmem>>, vector<1x16x16xf32>
    %574 = vector.shape_cast %573 : vector<1x16x16xf32> to vector<16x16xf32>
    %c93 = arith.constant 93 : index
    %575 = memref.load %arg1[%c93] : memref<98xf32, #tpu.memory_space<smem>>
    %576 = vector.broadcast %575 : f32 to vector<16x16xf32>
    %577 = arith.mulf %574, %576 : vector<16x16xf32>
    %578 = arith.addf %572, %577 : vector<16x16xf32>
    %c1_299 = arith.constant 1 : index
    %c6_300 = arith.constant 6 : index
    %c3_301 = arith.constant 3 : index
    %579 = vector.load %arg4[%c1_299, %c6_300, %c3_301] : memref<2x22x22xf32, #tpu.memory_space<vmem>>, vector<1x16x16xf32>
    %580 = vector.shape_cast %579 : vector<1x16x16xf32> to vector<16x16xf32>
    %c94 = arith.constant 94 : index
    %581 = memref.load %arg1[%c94] : memref<98xf32, #tpu.memory_space<smem>>
    %582 = vector.broadcast %581 : f32 to vector<16x16xf32>
    %583 = arith.mulf %580, %582 : vector<16x16xf32>
    %584 = arith.addf %578, %583 : vector<16x16xf32>
    %c1_302 = arith.constant 1 : index
    %c6_303 = arith.constant 6 : index
    %c4_304 = arith.constant 4 : index
    %585 = vector.load %arg4[%c1_302, %c6_303, %c4_304] : memref<2x22x22xf32, #tpu.memory_space<vmem>>, vector<1x16x16xf32>
    %586 = vector.shape_cast %585 : vector<1x16x16xf32> to vector<16x16xf32>
    %c95 = arith.constant 95 : index
    %587 = memref.load %arg1[%c95] : memref<98xf32, #tpu.memory_space<smem>>
    %588 = vector.broadcast %587 : f32 to vector<16x16xf32>
    %589 = arith.mulf %586, %588 : vector<16x16xf32>
    %590 = arith.addf %584, %589 : vector<16x16xf32>
    %c1_305 = arith.constant 1 : index
    %c6_306 = arith.constant 6 : index
    %c5_307 = arith.constant 5 : index
    %591 = vector.load %arg4[%c1_305, %c6_306, %c5_307] : memref<2x22x22xf32, #tpu.memory_space<vmem>>, vector<1x16x16xf32>
    %592 = vector.shape_cast %591 : vector<1x16x16xf32> to vector<16x16xf32>
    %c96 = arith.constant 96 : index
    %593 = memref.load %arg1[%c96] : memref<98xf32, #tpu.memory_space<smem>>
    %594 = vector.broadcast %593 : f32 to vector<16x16xf32>
    %595 = arith.mulf %592, %594 : vector<16x16xf32>
    %596 = arith.addf %590, %595 : vector<16x16xf32>
    %c1_308 = arith.constant 1 : index
    %c6_309 = arith.constant 6 : index
    %c6_310 = arith.constant 6 : index
    %597 = vector.load %arg4[%c1_308, %c6_309, %c6_310] : memref<2x22x22xf32, #tpu.memory_space<vmem>>, vector<1x16x16xf32>
    %598 = vector.shape_cast %597 : vector<1x16x16xf32> to vector<16x16xf32>
    %c97 = arith.constant 97 : index
    %599 = memref.load %arg1[%c97] : memref<98xf32, #tpu.memory_space<smem>>
    %600 = vector.broadcast %599 : f32 to vector<16x16xf32>
    %601 = arith.mulf %598, %600 : vector<16x16xf32>
    %602 = arith.addf %596, %601 : vector<16x16xf32>
    %cst_311 = arith.constant 0.000000e+00 : f32
    %603 = vector.broadcast %cst_311 : f32 to vector<16x16xf32>
    %604 = arith.subf %603, %602 : vector<16x16xf32>
    %605 = math.exp %604 : vector<16x16xf32>
    %cst_312 = arith.constant 1.000000e+00 : f32
    %606 = vector.broadcast %cst_312 : f32 to vector<16x16xf32>
    %607 = arith.addf %606, %605 : vector<16x16xf32>
    %cst_313 = arith.constant 1.000000e+00 : f32
    %608 = vector.broadcast %cst_313 : f32 to vector<16x16xf32>
    %609 = arith.divf %608, %607 : vector<16x16xf32>
    %c0_314 = arith.constant 0 : index
    %c0_315 = arith.constant 0 : index
    %c0_316 = arith.constant 0 : index
    %610 = vector.load %arg3[%c0_314, %c0_315, %c0_316] : memref<1x16x16xf32, #tpu.memory_space<vmem>>, vector<1x16x16xf32>
    %611 = vector.shape_cast %610 : vector<1x16x16xf32> to vector<16x16xf32>
    %612 = vector.shape_cast %609 : vector<16x16xf32> to vector<1x16x16xf32>
    tpu.vector_store %arg3[%c0_314, %c0_315, %c0_316], %612 {strides = array<i32>} : memref<1x16x16xf32, #tpu.memory_space<vmem>>, vector<1x16x16xf32>,
    return
  }
  func.func @transform_0(%arg0: i32) -> i32 {
    %c0_i32 = arith.constant 0 : i32
    %c0_i32_0 = arith.constant 0 : i32
    return %c0_i32 : i32
  }
  func.func @transform_1(%arg0: i32) -> (i32, i32, i32, i32) {
    %c0_i32 = arith.constant 0 : i32
    %c0_i32_0 = arith.constant 0 : i32
    %c0_i32_1 = arith.constant 0 : i32
    %c0_i32_2 = arith.constant 0 : i32
    return %arg0, %c0_i32, %c0_i32_0, %c0_i32_1 : i32, i32, i32, i32
  }
  func.func @transform_2(%arg0: i32) -> (i32, i32, i32) {
    %c0_i32 = arith.constant 0 : i32
    %c0_i32_0 = arith.constant 0 : i32
    %c0_i32_1 = arith.constant 0 : i32
    return %arg0, %c0_i32, %c0_i32_0 : i32, i32, i32
  }
}

</mosaic_0001>

<bundles_post_ra>
// kernel: tpu_custom_call.1
= control target key start
LH: loop header
LB: loop body
LE: loop exit
PB: predicated region body
PF: predicated region fallthrough
CT: control target
= control target key end

     0   :  { %7 = vsyncpa [#allocation6], 0  ;;  %s2784_s0 = inlined_call_operand.hbm [shape: f32[98], index: 0, kind: input, shape index: {}]   ;;  %s2785_s1 = inlined_call_operand.hbm [shape: f32[2,4,16,16], index: 1, kind: input, shape index: {}]   ;;  %s2786_s2 = inlined_call_operand.hbm [shape: f32[2,16,16], index: 2, kind: output, shape index: {}]  }
   0x1   :  { %8 = vsyncpa [#allocation4], 0 }
   0x2   :  { %10 = vsyncpa [#allocation4 + $0x1], 0 }
   0x3   :  { %11 = vsyncpa [#allocation5], 0 }
   0x4   :  { %13 = vsyncpa [#allocation5 + $0x1], 0  ;;  %s1976_s9 = smov 0   ;;  %s1978_s10 = smov 0  }
   0x5   :  { %s1980_s11 = smov 0   ;;  %s1982_s12 = smov 0  }
   0x6 LB: > { %s1997_s13 = sadd.s32 4294967295, %s1944_s12   ;;  %s1645_s14 = sadd.s32 4294967294, %s1944_s12   ;;  %s1944_s12 = sphi %s1982_s12, %s2808_s12   ;;  %s1940_s11 = sphi %s1980_s11, %s2807_s11   ;;  %s1936_s10 = sphi %s1978_s10, %s2806_s10   ;;  %s1932_s9 = sphi %s1976_s9, %s2805_s9  }
   0x7   : > { %s2001_s15 = sadd.s32 1, %s1944_s12   ;;  %s47_s16 = sadd.s32 1, %s1940_s11 }
   0x8   : > { %s44_s17 = ssub.s32 %s1944_s12, %s2001_s15  ;;  %p54_p0 = scmp.ne.s32.totalorder %s1940_s11, %s1936_s10 }
   0x9   : > { %p45_p1 = scmp.eq.s32.totalorder %s44_s17, 0  ;;  %p55_p2 = scmp.eq.s32.totalorder %s1944_s12, 0 }
   0xa   : > { %p60_p3 = scmp.ne.s32.totalorder %s1936_s10, %s1932_s9  ;;  %p2787_p4 = scmp.eq.s32.totalorder %s1997_s13, 0 }
   0xb   : > { %s2013_s18 = scalar_select %p45_p1, %s1940_s11, %s47_s16  }
   0xc   : > { %p2015_p5 = por %p55_p2, %p54_p0  ;;  %p2021_p6 = por %p2787_p4, %p60_p3 }
   0xd   : > { %p84_p7 = scmp.eq.s32.totalorder %s1997_s13, 1  ;;  %p90_p8 = scmp.eq.s32.totalorder %s1645_s14, 1 }
   0xe   : > { %s2792_s20 = scalar_select %p2021_p6, 1, 0 }
   0xf   : > { %p1646_p9 = scmp.ge.s32.totalorder %s1944_s12, 1  ;;  %p97_p10 = scmp.lt.s32.totalorder %s1944_s12, 3 }
  0x10   : > { %p2028_p11 = por %p84_p7, %p54_p0  ;;  %p2032_p12 = por %p90_p8, %p60_p3 }
  0x11   : > { %p2036_p13 = pnand %p1646_p9, %p97_p10  ;;  %p1781_p4 = scmp.lt.s32.totalorder %s1944_s12, 2 }
  0x12   : > { %s2793_s21 = scalar_select %p2028_p11, 1, 0 }
  0x13   : > { %s2794_s22 = scalar_select %p2032_p12, 1, 0 }
  0x14   : > { %s2795_s23 = scalar_select %p2036_p13, 1, 0 }
  0x15   : > { %p1768_p2 = pneg %p2036_p13  ;;  %s119_s24 = sand.u32 1, %s1940_s11  }
  0x16   : > { %s1758_s25 = sshll.u32 %s1944_s12, 10  ;;  %p2796_p6 = scmp.eq.s32.totalorder %s1997_s13, 0 }
  0x17   : > { %p2050_p7 = pnand %p1781_p4, %p2015_p5  ;;  %s1649_s27 = sshll.u32 %s119_s24, 6 }
  0x18   : > { %p1769_p0 = pnand %p1768_p2, %p2796_p6  ;;  %s1946_s28 = smov [#allocation3]  }
  0x19   : > { %s2060_s5 = scalar_lea.hbm %s2785_s1, %s1758_s25  ;;  %s123_s6 = scalar_lea.vmem [#allocation7], %s1649_s27 }
  0x1a   : > { %1771 = dma.hbm_to_smem (!%p1769_p0), %s2784_s0, 16, %s1946_s28, [#allocation6]  }
  0x1b   : > { %s130_s7 = sshll.u32 %s123_s6, 4  ;;  %s2064_s8 = scalar_lea.sflag [#allocation4], %s119_s24  ;;  %s2062_s7 = int_to_ptr.vmem [resolvable:$true] %s130_s7 }
  0x1c   : > { %s1848_s14 = scalar_lea.hbm %s2060_s5, 1024  ;;  %p1850_p4 = pneg %p2050_p7 }
  0x1d   : > { %p1849_p3 = scmp.ne.s32.totalorder %s2060_s5, %s1848_s14  ;;  %s1853_s19 = scalar_lea.hbm %s2785_s1, 2048 }
  0x1e   : > { %p1854_p8 = scmp.lt.s32.totalorder %s2060_s5, %s2785_s1  ;;  %p1855_p9 = scmp.lt.s32.totalorder %s1853_s19, %s1848_s14 }
  0x1f   : > { %p1851_p5 = pnand %p1850_p4, %p1849_p3 }
  0x20   : > { %p1856_p10 = por %p1855_p9, %p1854_p8 }
  0x21   : > { %p1852_p6 = pneg %p1851_p5 }
  0x23   : > { %p1857_p2 = pnand %p1856_p10, %p1852_p6 }
  0x25   : > { %1860 = shalt.err (!%p1857_p2)
}
  0x26   : > { %s1861_s24 = scalar_lea.vmem %s2062_s7, 1024  ;;  %s1947_s27 = smov [#allocation7]  }
  0x27   : > { %p1862_p0 = scmp.ne.s32.totalorder %s2062_s7, %s1861_s24  ;;  %s1866_s29 = sshll.u32 %s1947_s27, 4  ;;  %s1867_s29 = int_to_ptr.vmem [resolvable:$false] %s1866_s29 }
  0x28   : > { %s1868_s30 = scalar_lea.vmem %s1867_s29, 2048  ;;  %p1869_p5 = scmp.lt.s32.totalorder %s2062_s7, %s1867_s29 }
  0x29   : > { %p1864_p1 = pnand %p1862_p0, %p1850_p4  ;;  %p1870_p12 = scmp.lt.s32.totalorder %s1868_s30, %s1861_s24 }
  0x2b   : > { %p1865_p3 = pneg %p1864_p1  ;;  %p1871_p11 = por %p1870_p12, %p1869_p5 }
  0x2d   : > { %p1872_p13 = pnand %p1871_p11, %p1865_p3 }
  0x2f   : > { %1875 = shalt.err (!%p1872_p13)
}
  0x30   : > { %s1948_s3 = smov 128   ;;  %s1949_s4 = smov 8  }
  0x31   : > { %1775 = dma.hbm_to_vmem [thread:$0]  (!%p2050_p7), %s2060_s5, 1024, %s2062_s7, %s2064_s8, %s1948_s3, %s1948_s3, %s1949_s4  }
  0x32   : > { %p2798_p4 = scmp.ne.s32.totalorder %s2795_s23, 0 }
  0x33   : > { %p2799_p1 = scmp.eq.s32.totalorder (!%p2798_p4), %s1997_s13, 0 }
  0x34   : > { %142 = sbr.rel (%p2798_p4) target bundleno = 700 (0x2bc), region = 28 }
  0x39   : > { %1919 = dma.done.wait (%p2799_p1), [#allocation6], 16   ;;  %p2800_p6 = pmov %p2799_p1 }
  0x3a   : > { %s2092_s6 = sand.u32 1, %s1936_s10   ;;  %p2801_p11 = scmp.ne.s32.totalorder %s2792_s20, 0 }
  0x3b   : > { %1921 = vsyncadd (%p2800_p6), [#allocation6], 4294967280  ;;  %s1654_s14 = sshll.u32 %s2092_s6, 6  ;;  %s149_s16 = scalar_lea.sflag [#allocation4], %s2092_s6 }
  0x3c   : > { %s152_s17 = scalar_lea.vmem [#allocation7], %s1654_s14 }
  0x3d   : > { %1923 = dma.done.wait (%p2801_p11), %s149_s16, 1024  }
  0x3e   : > { %1925 = vsyncadd (%p2801_p11), %s149_s16, 4294966272 }
  0x3f   : > { %157 = sfence }
  0x40   : > { %v174_v0 = vld [vmem:[%s152_s17] sm:$0xff]  ;;  %v176_v1 = vld [vmem:[%s152_s17 + $0x10] sm:$0xff]  ;;  %vm182_vm0 = vcmask 130048   ;;  %vm214_vm1 = vcmask 179200   ;;  %v175_v7 = vld [vmem:[%s152_s17 + $0x8] sm:$0xff]  ;;  %v1950_v19 = vmov 0.0  }
  0x41   : > { %v178_v2 = vld [vmem:[%s152_s17 + $0x20] sm:$0xff]  ;;  %v180_v3 = vld [vmem:[%s152_s17 + $0x30] sm:$0xff]  ;;  %v183_v4 = vsel %vm182_vm0, %v174_v0, 0.0  ;;  %v184_v5 = vsel %vm182_vm0, %v176_v1, 0.0  ;;  %v177_v8 = vld [vmem:[%s152_s17 + $0x18] sm:$0xff]  ;;  %v190_v12 = vsel %vm182_vm0, %v175_v7, 0.0 }
  0x42   : > { %v186_v6 = vsel %vm182_vm0, %v178_v2, 0.0  ;;  %v185_v9 = vadd.f32 %v184_v5, %v183_v4  ;;  %v179_v10 = vld [vmem:[%s152_s17 + $0x28] sm:$0xff]  ;;  %v181_v11 = vld [vmem:[%s152_s17 + $0x38] sm:$0xff]  ;;  %v191_v13 = vsel %vm182_vm0, %v177_v8, 0.0  ;;  %v188_v14 = vsel %vm182_vm0, %v180_v3, 0.0  ;;  %215 = vst.msk [vmem:[#allocation2] sm:$0xff] %vm214_vm1, %v1950_v19 }
  0x43   : > { %v192_v15 = vadd.f32 %v191_v13, %v190_v12  ;;  %v193_v16 = vsel %vm182_vm0, %v179_v10, 0.0  ;;  %v195_v18 = vsel %vm182_vm0, %v181_v11, 0.0  ;;  %216 = vst.msk [vmem:[#allocation2 + $0x8] sm:$0xff] %vm214_vm1, %v1950_v19  ;;  %219 = vst.msk [vmem:[#allocation2 + $0x18] sm:$0xff] %vm214_vm1, %v1950_v19  ;;  %v200_v20 = vsel %vm182_vm0, %v174_v0, -inf  ;;  %s1951_s20 = smov 3  }
  0x44   : > { %v187_v17 = vadd.f32 %v186_v6, %v185_v9  ;;  %220 = vst.msk [vmem:[#allocation2 + $0x20] sm:$0xff] %vm214_vm1, %v1950_v19  ;;  %v201_v21 = vsel %vm182_vm0, %v176_v1, -inf  ;;  %v202_v23 = vsel %vm182_vm0, %v178_v2, -inf  ;;  %v204_v24 = vsel %vm182_vm0, %v180_v3, -inf  ;;  %s1656_s23 = sld [smem:[#allocation3 + $0x1]]  ;;  %s1952_s8 = smov 127  }
  0x45   : > { %v194_v22 = vadd.f32 %v193_v16, %v192_v15  ;;  %vm217_vm2 = vcmask 177152   ;;  %v203_v26 = vmax.f32 %v200_v20, %v202_v23  ;;  %v205_v27 = vmax.f32 %v201_v21, %v204_v24  ;;  %s1657_s26 = sld [smem:[#allocation3 + $0x2]]  ;;  %s1953_s25 = smov 126  }
  0x46   : > { %v189_v25 = vadd.f32 %v188_v14, %v187_v17  ;;  %218 = vst.msk [vmem:[#allocation2 + $0x10] sm:$0x3f] %vm217_vm2, %v1950_v19  ;;  %221 = vst.msk [vmem:[#allocation2 + $0x28] sm:$0x3f] %vm217_vm2, %v1950_v19  ;;  %v207_v28 = vsel %vm182_vm0, %v175_v7, -inf  ;;  %v208_v30 = vsel %vm182_vm0, %v177_v8, -inf }
  0x47   : > { %v196_v29 = vadd.f32 %v195_v18, %v194_v22  ;;  %v209_v31 = vsel %vm182_vm0, %v179_v10, -inf  ;;  %v211_v32 = vsel %vm182_vm0, %v181_v11, -inf  ;;  %v206_v34 = vmax.f32 %v203_v26, %v205_v27  ;;  %s1658_s5 = sld [smem:[#allocation3 + $0x3]]  ;;  %s1954_s24 = smov 125  }
  0x48   : > { %v198_v33 = vmul.f32 0.25, %v189_v25  ;;  %v210_v35 = vmax.f32 %v207_v28, %v209_v31  ;;  %v212_v36 = vmax.f32 %v208_v30, %v211_v32  ;;  %vm230_vm3 = vcmask 154648   ;;  %s1659_s7 = sld [smem:[#allocation3 + $0x4]]  ;;  %s1955_s29 = smov 124  }
  0x49   : > { %v199_v37 = vmul.f32 0.25, %v196_v29  ;;  %235 = vrot.lane.b32.xlu1 %v206_v34, %s1951_s20  ;;  %s1660_s19 = sld [smem:[#allocation3 + $0x5]]  ;;  %s1956_s3 = smov 123  }
  0x4a   : > { %224 = vrot.lane.b32.xlu0 %v198_v33, %s1951_s20  ;;  %v213_v38 = vmax.f32 %v210_v35, %v212_v36  ;;  %v253_v43 = vstv %s1656_s23  ;;  %s1661_s28 = sld [smem:[#allocation3 + $0x6]]  ;;  %s1957_s14 = smov 122  }
  0x4b   : > { %v267_v46 = vstv %s1657_s26  ;;  %s1663_s27 = sld [smem:[#allocation3 + $0x8]]  ;;  %p2802_p13 = scmp.ne.s32.totalorder %s2793_s21, 0 }
  0x4c   : > { %s1664_s30 = sld [smem:[#allocation3 + $0x9]] }
  0x4d   : > { %237 = vrot.lane.b32.xlu1 %v213_v38, %s1951_s20  ;;  %v281_v50 = vstv %s1658_s5  ;;  %s1665_s4 = sld [smem:[#allocation3 + $0xa]] }
  0x4e   : > { %226 = vrot.lane.b32.xlu0 %v199_v37, %s1951_s20  ;;  %v295_v53 = vstv %s1659_s7  ;;  %s1666_s16 = sld [smem:[#allocation3 + $0xb]] }
  0x4f   : > { %v309_v56 = vstv %s1660_s19  ;;  %s1667_s17 = sld [smem:[#allocation3 + $0xc]] }
  0x50   : > { %v323_v59 = vstv %s1661_s28  ;;  %s1668_s20 = sld [smem:[#allocation3 + $0xd]] }
  0x51   : > { %v345_v63 = vstv %s1663_s27  ;;  %s1670_s23 = sld [smem:[#allocation3 + $0xf]] }
  0x52   : > { %v359_v3 = vstv %s1664_s30  ;;  %s1671_s26 = sld [smem:[#allocation3 + $0x10]] }
  0x53   : > { %v373_v6 = vstv %s1665_s4  ;;  %s1672_s5 = sld [smem:[#allocation3 + $0x11]] }
  0x54   : > { %v387_v9 = vstv %s1666_s16  ;;  %s1673_s7 = sld [smem:[#allocation3 + $0x12]] }
  0x55   : > { %v401_v12 = vstv %s1667_s17  ;;  %s1674_s19 = sld [smem:[#allocation3 + $0x13]] }
  0x56   : > { %v415_v15 = vstv %s1668_s20  ;;  %s1675_s28 = sld [smem:[#allocation3 + $0x14]] }
  0x57   : > { %v437_v19 = vstv %s1670_s23  ;;  %s1677_s27 = sld [smem:[#allocation3 + $0x16]] }
  0x58   : > { %v451_v23 = vstv %s1671_s26  ;;  %s1678_s30 = sld [smem:[#allocation3 + $0x17]] }
  0x59   : > { %v465_v26 = vstv %s1672_s5  ;;  %s1679_s4 = sld [smem:[#allocation3 + $0x18]] }
  0x5a   : > { %v479_v29 = vstv %s1673_s7  ;;  %s1680_s16 = sld [smem:[#allocation3 + $0x19]] }
  0x5b   : > { %v493_v32 = vstv %s1674_s19  ;;  %s1681_s17 = sld [smem:[#allocation3 + $0x1a]] }
  0x5c   : > { %v507_v35 = vstv %s1675_s28  ;;  %s1682_s20 = sld [smem:[#allocation3 + $0x1b]] }
  0x5d   : > { %s1684_s23 = sld [smem:[#allocation3 + $0x1d]] }
  0x5e   : > { %s1685_s26 = sld [smem:[#allocation3 + $0x1e]] }
  0x5f   : > { %s1686_s5 = sld [smem:[#allocation3 + $0x1f]] }
  0x60   : > { %s1687_s7 = sld [smem:[#allocation3 + $0x20]] }
  0x61   : > { %s1688_s19 = sld [smem:[#allocation3 + $0x21]] }
  0x62   : > { %s1689_s28 = sld [smem:[#allocation3 + $0x22]] }
  0xbb   : > { %v236_v40 = vpop.permute.xlu1 %235 }
  0xbc   : > { %v225_v39 = vpop.permute.xlu0 %224  ;;  %242 = vst.msk [vmem:[#allocation2 + $0x1b] sm:$0xff] %vm230_vm3, %v236_v40 }
  0xbd   : > { %231 = vst.msk [vmem:[#allocation2 + $0x3] sm:$0xff] %vm230_vm3, %v225_v39  ;;  %v529_v39 = vstv %s1677_s27  ;;  %s2248_s27 = sld [smem:[#allocation3 + $0x24]] }
  0xbf   : > { %v238_v42 = vpop.permute.xlu1 %237 }
  0xc0   : > { %v227_v41 = vpop.permute.xlu0 %226  ;;  %243 = vst.msk [vmem:[#allocation2 + $0x23] sm:$0xff] %vm230_vm3, %v238_v42 }
  0xc1   : > { %232 = vst.msk [vmem:[#allocation2 + $0xb] sm:$0xff] %vm230_vm3, %v227_v41 }
  0xc4   : > { %v2120_v44 = vld [vmem:[#allocation2] sm:$0xff] }
  0xc5   : > { %v254_v45 = vmul.f32 %v253_v43, %v2120_v44  ;;  %v268_v48 = vmul.f32 %v267_v46, %v2120_v44  ;;  %v282_v51 = vmul.f32 %v281_v50, %v2120_v44  ;;  %v296_v54 = vmul.f32 %v295_v53, %v2120_v44  ;;  %v2144_v62 = vld [vmem:[#allocation2 + $0x1] sm:$0xff] }
  0xc6   : > { %v310_v57 = vmul.f32 %v309_v56, %v2120_v44  ;;  %v324_v60 = vmul.f32 %v323_v59, %v2120_v44  ;;  %v346_v0 = vmul.f32 %v345_v63, %v2144_v62  ;;  %v360_v4 = vmul.f32 %v359_v3, %v2144_v62  ;;  %v2172_v18 = vld [vmem:[#allocation2 + $0x2] sm:$0xff] }
  0xc7   : > { %258 = vrot.lane.b32.xlu0 %v254_v45, %s1952_s8  ;;  %v374_v7 = vmul.f32 %v373_v6, %v2144_v62  ;;  %v388_v10 = vmul.f32 %v387_v9, %v2144_v62  ;;  %v402_v13 = vmul.f32 %v401_v12, %v2144_v62  ;;  %v416_v16 = vmul.f32 %v415_v15, %v2144_v62  ;;  %v2200_v38 = vld [vmem:[#allocation2 + $0x3] sm:$0xff] }
  0xc8   : > { %v2124_v47 = vld [vmem:[#allocation2 + $0x8] sm:$0xff]  ;;  %v438_v20 = vmul.f32 %v437_v19, %v2172_v18  ;;  %v452_v24 = vmul.f32 %v451_v23, %v2172_v18  ;;  %v466_v27 = vmul.f32 %v465_v26, %v2172_v18  ;;  %v480_v30 = vmul.f32 %v479_v29, %v2172_v18 }
  0xc9   : > { %v255_v49 = vmul.f32 %v253_v43, %v2124_v47  ;;  %v269_v52 = vmul.f32 %v267_v46, %v2124_v47  ;;  %v283_v55 = vmul.f32 %v281_v50, %v2124_v47  ;;  %v297_v58 = vmul.f32 %v295_v53, %v2124_v47  ;;  %v2150_v2 = vld [vmem:[#allocation2 + $0x9] sm:$0xff] }
  0xca   : > { %v311_v61 = vmul.f32 %v309_v56, %v2124_v47  ;;  %v325_v1 = vmul.f32 %v323_v59, %v2124_v47  ;;  %v347_v5 = vmul.f32 %v345_v63, %v2150_v2  ;;  %v361_v8 = vmul.f32 %v359_v3, %v2150_v2  ;;  %v2178_v22 = vld [vmem:[#allocation2 + $0xa] sm:$0xff] }
  0xcb   : > { %272 = vrot.lane.b32.xlu0 %v268_v48, %s1953_s25  ;;  %260 = vrot.lane.b32.xlu1 %v255_v49, %s1952_s8  ;;  %v375_v11 = vmul.f32 %v373_v6, %v2150_v2  ;;  %v389_v14 = vmul.f32 %v387_v9, %v2150_v2  ;;  %v403_v17 = vmul.f32 %v401_v12, %v2150_v2  ;;  %v2206_v42 = vld [vmem:[#allocation2 + $0xb] sm:$0xff]  ;;  %v543_v43 = vstv %s1678_s30  ;;  %s2254_s30 = sld [smem:[#allocation3 + $0x25]] }
  0xcc   : > { %v417_v21 = vmul.f32 %v415_v15, %v2150_v2  ;;  %v439_v25 = vmul.f32 %v437_v19, %v2178_v22  ;;  %v453_v28 = vmul.f32 %v451_v23, %v2178_v22  ;;  %v467_v31 = vmul.f32 %v465_v26, %v2178_v22 }
  0xcd   : > { %v494_v33 = vmul.f32 %v493_v32, %v2172_v18  ;;  %v481_v34 = vmul.f32 %v479_v29, %v2178_v22  ;;  %v508_v36 = vmul.f32 %v507_v35, %v2172_v18  ;;  %v495_v37 = vmul.f32 %v493_v32, %v2178_v22 }
  0xce   : > { %v530_v40 = vmul.f32 %v529_v39, %v2200_v38  ;;  %v509_v41 = vmul.f32 %v507_v35, %v2178_v22  ;;  %v544_v45 = vmul.f32 %v543_v43, %v2200_v38  ;;  %v531_v46 = vmul.f32 %v529_v39, %v2206_v42 }
  0xcf   : > { %286 = vrot.lane.b32.xlu0 %v282_v51, %s1954_s24  ;;  %274 = vrot.lane.b32.xlu1 %v269_v52, %s1953_s25  ;;  %v557_v48 = vstv %s1679_s4  ;;  %v545_v50 = vmul.f32 %v543_v43, %v2206_v42  ;;  %v571_v51 = vstv %s1680_s16  ;;  %s2256_s4 = sld [smem:[#allocation3]] }
  0xd0   : > { %v558_v49 = vmul.f32 %v557_v48, %v2200_v38  ;;  %v572_v52 = vmul.f32 %v571_v51, %v2200_v38  ;;  %v559_v53 = vmul.f32 %v557_v48, %v2206_v42  ;;  %v573_v56 = vmul.f32 %v571_v51, %v2206_v42  ;;  %s2265_s16 = sld [smem:[#allocation3 + $0x26]] }
  0xd1   : > { %v635_v3 = vstv %s1685_s26  ;;  %v649_v6 = vstv %s1686_s5  ;;  %v663_v9 = vstv %s1687_s7  ;;  %v677_v12 = vstv %s1688_s19  ;;  %s2293_s26 = sld [smem:[#allocation3 + $0x29]] }
  0xd2   : > { %v691_v15 = vstv %s1689_s28  ;;  %s2300_s5 = sld [smem:[#allocation3 + $0x2b]] }
  0xd3   : > { %300 = vrot.lane.b32.xlu0 %v296_v54, %s1955_s29  ;;  %288 = vrot.lane.b32.xlu1 %v283_v55, %s1954_s24  ;;  %v585_v54 = vstv %s1681_s17  ;;  %s2274_s17 = sld [smem:[#allocation3 + $0x27]] }
  0xd4   : > { %v586_v55 = vmul.f32 %v585_v54, %v2200_v38  ;;  %v587_v59 = vmul.f32 %v585_v54, %v2206_v42  ;;  %s2309_s7 = sld [smem:[#allocation3 + $0x2c]] }
  0xd5   : > { %v247_v29 = vstv %s2256_s4  ;;  %s2319_s19 = sld [smem:[#allocation3 + $0x2d]] }
  0xd6   : > { %v741_v35 = vstv %s2265_s16  ;;  %v249_v43 = vmul.f32 %v247_v29, %v2124_v47  ;;  %s2328_s28 = sld [smem:[#allocation3 + $0x2e]] }
  0xd7   : > { %314 = vrot.lane.b32.xlu0 %v310_v57, %s1956_s3  ;;  %302 = vrot.lane.b32.xlu1 %v297_v58, %s1955_s29  ;;  %v599_v57 = vstv %s1682_s20  ;;  %s2283_s20 = sld [smem:[#allocation3 + $0x28]] }
  0xd8   : > { %v600_v58 = vmul.f32 %v599_v57, %v2200_v38  ;;  %s2344_s4 = sld [smem:[#allocation3 + $0x30]] }
  0xd9   : > { %s2351_s16 = sld [smem:[#allocation3 + $0x32]] }
  0xdb   : > { %328 = vrot.lane.b32.xlu0 %v324_v60, %s1957_s14  ;;  %316 = vrot.lane.b32.xlu1 %v311_v61, %s1956_s3  ;;  %v2228_v60 = vld [vmem:[#allocation2 + $0x4] sm:$0xff]  ;;  %v621_v61 = vstv %s1684_s23  ;;  %s2285_s23 = sld [smem:[#allocation3 + $0x7]] }
  0xdc   : > { %v622_v63 = vmul.f32 %v621_v61, %v2228_v60 }
  0xdd   : > { %v769_v54 = vstv %s2283_s20  ;;  %s2370_s20 = sld [smem:[#allocation3 + $0x34]] }
  0xdf   : > { %350 = vrot.lane.b32.xlu0 %v346_v0, %s1952_s8  ;;  %330 = vrot.lane.b32.xlu1 %v325_v1, %s1957_s14  ;;  %v601_v0 = vmul.f32 %v599_v57, %v2206_v42  ;;  %v2234_v1 = vld [vmem:[#allocation2 + $0xc] sm:$0xff] }
  0xe0   : > { %v679_v19 = vmul.f32 %v677_v12, %v2234_v1  ;;  %v693_v26 = vmul.f32 %v691_v15, %v2234_v1 }
  0xe3   : > { %364 = vrot.lane.b32.xlu0 %v360_v4, %s1953_s25  ;;  %352 = vrot.lane.b32.xlu1 %v347_v5, %s1952_s8  ;;  %v636_v4 = vmul.f32 %v635_v3, %v2228_v60  ;;  %v623_v5 = vmul.f32 %v621_v61, %v2234_v1 }
  0xe7   : > { %378 = vrot.lane.b32.xlu0 %v374_v7, %s1954_s24  ;;  %366 = vrot.lane.b32.xlu1 %v361_v8, %s1953_s25  ;;  %v650_v7 = vmul.f32 %v649_v6, %v2228_v60  ;;  %v637_v8 = vmul.f32 %v635_v3, %v2234_v1 }
  0xeb   : > { %392 = vrot.lane.b32.xlu0 %v388_v10, %s1955_s29  ;;  %380 = vrot.lane.b32.xlu1 %v375_v11, %s1954_s24  ;;  %v664_v10 = vmul.f32 %v663_v9, %v2228_v60  ;;  %v651_v11 = vmul.f32 %v649_v6, %v2234_v1 }
  0xef   : > { %406 = vrot.lane.b32.xlu0 %v402_v13, %s1956_s3  ;;  %394 = vrot.lane.b32.xlu1 %v389_v14, %s1955_s29  ;;  %v678_v13 = vmul.f32 %v677_v12, %v2228_v60  ;;  %v665_v14 = vmul.f32 %v663_v9, %v2234_v1  ;;  %v2316_v12 = vld [vmem:[#allocation2 + $0x6] sm:$0xff] }
  0xf3   : > { %420 = vrot.lane.b32.xlu0 %v416_v16, %s1957_s14  ;;  %408 = vrot.lane.b32.xlu1 %v403_v17, %s1956_s3  ;;  %v692_v17 = vmul.f32 %v691_v15, %v2228_v60 }
  0xf7   : > { %442 = vrot.lane.b32.xlu0 %v438_v20, %s1952_s8  ;;  %422 = vrot.lane.b32.xlu1 %v417_v21, %s1957_s14  ;;  %v2262_v20 = vld [vmem:[#allocation2 + $0x5] sm:$0xff]  ;;  %v713_v21 = vstv %s2248_s27  ;;  %s2335_s27 = sld [smem:[#allocation3 + $0x2f]] }
  0xf8   : > { %v770_v61 = vmul.f32 %v769_v54, %v2262_v20 }
  0xfb   : > { %456 = vrot.lane.b32.xlu0 %v452_v24, %s1953_s25  ;;  %444 = vrot.lane.b32.xlu1 %v439_v25, %s1952_s8  ;;  %v714_v25 = vmul.f32 %v713_v21, %v2262_v20 }
  0xff   : > { %470 = vrot.lane.b32.xlu0 %v466_v27, %s1954_s24  ;;  %458 = vrot.lane.b32.xlu1 %v453_v28, %s1953_s25  ;;  %v2271_v27 = vld [vmem:[#allocation2 + $0xd] sm:$0xff]  ;;  %v727_v28 = vstv %s2254_s30  ;;  %s2337_s30 = sld [smem:[#allocation3 + $0xe]] }
 0x100   : > { %v728_v32 = vmul.f32 %v727_v28, %v2262_v20 }
 0x103   : > { %484 = vrot.lane.b32.xlu0 %v480_v30, %s1955_s29  ;;  %472 = vrot.lane.b32.xlu1 %v467_v31, %s1954_s24 }
 0x107   : > { %498 = vrot.lane.b32.xlu0 %v494_v33, %s1956_s3  ;;  %486 = vrot.lane.b32.xlu1 %v481_v34, %s1955_s29  ;;  %v715_v33 = vmul.f32 %v713_v21, %v2271_v27  ;;  %v248_v34 = vmul.f32 %v247_v29, %v2120_v44  ;;  %v833_v29 = vstv %s2319_s19  ;;  %s2402_s19 = sld [smem:[#allocation3 + $0x39]] }
 0x10b   : > { %512 = vrot.lane.b32.xlu0 %v508_v36, %s1957_s14  ;;  %500 = vrot.lane.b32.xlu1 %v495_v37, %s1956_s3 }
 0x10f   : > { %534 = vrot.lane.b32.xlu0 %v530_v40, %s1952_s8  ;;  %514 = vrot.lane.b32.xlu1 %v509_v41, %s1957_s14  ;;  %v742_v40 = vmul.f32 %v741_v35, %v2262_v20  ;;  %v729_v41 = vmul.f32 %v727_v28, %v2271_v27 }
 0x113   : > { %548 = vrot.lane.b32.xlu0 %v544_v45, %s1953_s25  ;;  %536 = vrot.lane.b32.xlu1 %v531_v46, %s1952_s8  ;;  %v755_v45 = vstv %s2274_s17  ;;  %s2360_s17 = sld [smem:[#allocation3 + $0x33]] }
 0x114   : > { %v756_v51 = vmul.f32 %v755_v45, %v2262_v20 }
 0x117   : > { %562 = vrot.lane.b32.xlu0 %v558_v49, %s1954_s24  ;;  %550 = vrot.lane.b32.xlu1 %v545_v50, %s1953_s25 }
 0x11b   : > { %576 = vrot.lane.b32.xlu0 %v572_v52, %s1955_s29  ;;  %564 = vrot.lane.b32.xlu1 %v559_v53, %s1954_s24  ;;  %v743_v52 = vmul.f32 %v741_v35, %v2271_v27 }
 0x11f   : > { %590 = vrot.lane.b32.xlu0 %v586_v55, %s1956_s3  ;;  %578 = vrot.lane.b32.xlu1 %v573_v56, %s1955_s29  ;;  %v339_v55 = vstv %s2285_s23  ;;  %s2379_s23 = sld [smem:[#allocation3 + $0x35]] }
 0x123   : > { %604 = vrot.lane.b32.xlu0 %v600_v58, %s1957_s14  ;;  %592 = vrot.lane.b32.xlu1 %v587_v59, %s1956_s3 }
 0x127   : > { %626 = vrot.lane.b32.xlu0 %v622_v63, %s1952_s8  ;;  %606 = vrot.lane.b32.xlu1 %v601_v0, %s1957_s14  ;;  %v757_v63 = vmul.f32 %v755_v45, %v2271_v27  ;;  %v340_v0 = vmul.f32 %v339_v55, %v2144_v62  ;;  %v341_v62 = vmul.f32 %v339_v55, %v2150_v2  ;;  %v819_v2 = vstv %s2309_s7  ;;  %s2395_s7 = sld [smem:[#allocation3 + $0x37]] }
 0x12b   : > { %640 = vrot.lane.b32.xlu0 %v636_v4, %s1953_s25  ;;  %628 = vrot.lane.b32.xlu1 %v623_v5, %s1952_s8  ;;  %v783_v5 = vstv %s2293_s26  ;;  %s2386_s26 = sld [smem:[#allocation3 + $0x36]] }
 0x12c   : > { %v785_v21 = vmul.f32 %v783_v5, %v2271_v27 }
 0x12f   : > { %654 = vrot.lane.b32.xlu0 %v650_v7, %s1954_s24  ;;  %642 = vrot.lane.b32.xlu1 %v637_v8, %s1953_s25 }
 0x133   : > { %668 = vrot.lane.b32.xlu0 %v664_v10, %s1955_s29  ;;  %656 = vrot.lane.b32.xlu1 %v651_v11, %s1954_s24  ;;  %v784_v10 = vmul.f32 %v783_v5, %v2262_v20  ;;  %v771_v11 = vmul.f32 %v769_v54, %v2271_v27 }
 0x137   : > { %682 = vrot.lane.b32.xlu0 %v678_v13, %s1956_s3  ;;  %670 = vrot.lane.b32.xlu1 %v665_v14, %s1955_s29  ;;  %v805_v14 = vstv %s2300_s5  ;;  %s2388_s5 = sld [smem:[#allocation3 + $0x15]] }
 0x139   : > { %v259_v16 = vpop.permute.xlu0 %258 }
 0x13a   : > { %v264_v36 = vadd.f32 %v259_v16, %v248_v34 }
 0x13b   : > { %696 = vrot.lane.b32.xlu0 %v692_v17, %s1957_s14  ;;  %684 = vrot.lane.b32.xlu1 %v679_v19, %s1956_s3  ;;  %v806_v19 = vmul.f32 %v805_v14, %v2316_v12 }
 0x13d   : > { %v261_v23 = vpop.permute.xlu1 %260  ;;  %v273_v24 = vpop.permute.xlu0 %272 }
 0x13e   : > { %v278_v44 = vadd.f32 %v273_v24, %v264_v36  ;;  %v265_v46 = vadd.f32 %v261_v23, %v249_v43  ;;  %v2325_v23 = vld [vmem:[#allocation2 + $0xe] sm:$0xff]  ;;  %v847_v36 = vstv %s2328_s28  ;;  %s2411_s28 = sld [smem:[#allocation3 + $0x3a]] }
 0x13f   : > { %718 = vrot.lane.b32.xlu0 %v714_v25, %s1952_s8  ;;  %698 = vrot.lane.b32.xlu1 %v693_v26, %s1957_s14  ;;  %v820_v26 = vmul.f32 %v819_v2, %v2316_v12  ;;  %v807_v28 = vmul.f32 %v805_v14, %v2325_v23  ;;  %v821_v34 = vmul.f32 %v819_v2, %v2325_v23 }
 0x140   : > { %v848_v43 = vmul.f32 %v847_v36, %v2316_v12  ;;  %v849_v54 = vmul.f32 %v847_v36, %v2325_v23 }
 0x141   : > { %v275_v30 = vpop.permute.xlu1 %274  ;;  %v287_v31 = vpop.permute.xlu0 %286 }
 0x142   : > { %v292_v48 = vadd.f32 %v287_v31, %v278_v44  ;;  %v279_v53 = vadd.f32 %v275_v30, %v265_v46  ;;  %v835_v44 = vmul.f32 %v833_v29, %v2325_v23 }
 0x143   : > { %732 = vrot.lane.b32.xlu0 %v728_v32, %s1953_s25  ;;  %720 = vrot.lane.b32.xlu1 %v715_v33, %s1952_s8  ;;  %v834_v33 = vmul.f32 %v833_v29, %v2316_v12  ;;  %v939_v29 = vstv %s2379_s23  ;;  %s2462_s23 = sld [smem:[#allocation3 + $0x41]] }
 0x145   : > { %v289_v37 = vpop.permute.xlu1 %288  ;;  %v301_v39 = vpop.permute.xlu0 %300 }
 0x146   : > { %v306_v47 = vadd.f32 %v301_v39, %v292_v48  ;;  %v293_v56 = vadd.f32 %v289_v37, %v279_v53  ;;  %v861_v48 = vstv %s2335_s27  ;;  %s2421_s27 = sld [smem:[#allocation3 + $0x3b]] }
 0x147   : > { %746 = vrot.lane.b32.xlu0 %v742_v40, %s1954_s24  ;;  %734 = vrot.lane.b32.xlu1 %v729_v41, %s1953_s25 }
 0x149   : > { %v303_v49 = vpop.permute.xlu1 %302  ;;  %v315_v50 = vpop.permute.xlu0 %314 }
 0x14a   : > { %v320_v57 = vadd.f32 %v315_v50, %v306_v47  ;;  %v307_v3 = vadd.f32 %v303_v49, %v293_v56  ;;  %v431_v49 = vstv %s2337_s30  ;;  %v862_v47 = vmul.f32 %v861_v48, %v2316_v12  ;;  %s2430_s30 = sld [smem:[#allocation3 + $0x3c]] }
 0x14b   : > { %760 = vrot.lane.b32.xlu0 %v756_v51, %s1955_s29  ;;  %748 = vrot.lane.b32.xlu1 %v743_v52, %s1954_s24  ;;  %v432_v55 = vmul.f32 %v431_v49, %v2172_v18  ;;  %v433_v18 = vmul.f32 %v431_v49, %v2178_v22  ;;  %v2377_v22 = vld [vmem:[#allocation2 + $0x20] sm:$0xff] }
 0x14d   : > { %v317_v58 = vpop.permute.xlu1 %316  ;;  %v329_v59 = vpop.permute.xlu0 %328 }
 0x14e   : > { %v334_v4 = vadd.f32 %v329_v59, %v320_v57  ;;  %v321_v6 = vadd.f32 %v317_v58, %v307_v3  ;;  %v875_v58 = vstv %s2344_s4  ;;  %s2437_s4 = sld [smem:[#allocation3 + $0x3d]] }
 0x14f   : > { %774 = vrot.lane.b32.xlu0 %v770_v61, %s1956_s3  ;;  %762 = vrot.lane.b32.xlu1 %v757_v63, %s1955_s29  ;;  %v876_v3 = vmul.f32 %v875_v58, %v2316_v12 }
 0x150   : > { %v342_v7 = vadd.f32 %v340_v0, %v334_v4  ;;  %v863_v4 = vmul.f32 %v861_v48, %v2325_v23  ;;  %v941_v48 = vmul.f32 %v939_v29, %v2377_v22 }
 0x151   : > { %v331_v8 = vpop.permute.xlu1 %330  ;;  %v351_v9 = vpop.permute.xlu0 %350 }
 0x152   : > { %v335_v13 = vadd.f32 %v331_v8, %v321_v6  ;;  %v356_v30 = vadd.f32 %v351_v9, %v342_v7  ;;  %v2367_v6 = vld [vmem:[#allocation2 + $0x18] sm:$0xff]  ;;  %v897_v7 = vstv %s2351_s16  ;;  %s2439_s16 = sld [smem:[#allocation3 + $0x1c]] }
 0x153   : > { %788 = vrot.lane.b32.xlu0 %v784_v10, %s1957_s14  ;;  %776 = vrot.lane.b32.xlu1 %v771_v11, %s1956_s3  ;;  %v898_v11 = vmul.f32 %v897_v7, %v2367_v6 }
 0x154   : > { %v343_v15 = vadd.f32 %v341_v62, %v335_v13  ;;  %v877_v62 = vmul.f32 %v875_v58, %v2325_v23  ;;  %v911_v13 = vstv %s2360_s17  ;;  %s2446_s17 = sld [smem:[#allocation3 + $0x3e]] }
 0x155   : > { %v353_v16 = vpop.permute.xlu1 %352  ;;  %v365_v17 = vpop.permute.xlu0 %364 }
 0x156   : > { %v370_v35 = vadd.f32 %v365_v17, %v356_v30  ;;  %v357_v37 = vadd.f32 %v353_v16, %v343_v15  ;;  %v912_v16 = vmul.f32 %v911_v13, %v2367_v6  ;;  %v899_v17 = vmul.f32 %v897_v7, %v2377_v22 }
 0x157   : > { %810 = vrot.lane.b32.xlu0 %v806_v19, %s1952_s8  ;;  %790 = vrot.lane.b32.xlu1 %v785_v21, %s1957_s14  ;;  %v925_v19 = vstv %s2370_s20  ;;  %s2453_s20 = sld [smem:[#allocation3 + $0x40]] }
 0x159   : > { %v367_v24 = vpop.permute.xlu1 %366  ;;  %v379_v25 = vpop.permute.xlu0 %378 }
 0x15a   : > { %v384_v39 = vadd.f32 %v379_v25, %v370_v35  ;;  %v371_v45 = vadd.f32 %v367_v24, %v357_v37  ;;  %v926_v25 = vmul.f32 %v925_v19, %v2367_v6  ;;  %v927_v35 = vmul.f32 %v925_v19, %v2377_v22 }
 0x15b   : > { %824 = vrot.lane.b32.xlu0 %v820_v26, %s1953_s25  ;;  %812 = vrot.lane.b32.xlu1 %v807_v28, %s1952_s8  ;;  %v913_v26 = vmul.f32 %v911_v13, %v2377_v22  ;;  %v1031_v19 = vstv %s2430_s30  ;;  %s2513_s30 = sld [smem:[#allocation3 + $0x48]] }
 0x15d   : > { %v381_v31 = vpop.permute.xlu1 %380  ;;  %v393_v32 = vpop.permute.xlu0 %392 }
 0x15e   : > { %v398_v46 = vadd.f32 %v393_v32, %v384_v39  ;;  %v385_v50 = vadd.f32 %v381_v31, %v371_v45  ;;  %v953_v39 = vstv %s2386_s26  ;;  %s2472_s26 = sld [smem:[#allocation3 + $0x42]] }
 0x15f   : > { %838 = vrot.lane.b32.xlu0 %v834_v33, %s1954_s24  ;;  %826 = vrot.lane.b32.xlu1 %v821_v34, %s1953_s25  ;;  %v940_v34 = vmul.f32 %v939_v29, %v2367_v6 }
 0x161   : > { %v395_v40 = vpop.permute.xlu1 %394  ;;  %v407_v41 = vpop.permute.xlu0 %406 }
 0x162   : > { %v412_v51 = vadd.f32 %v407_v41, %v398_v46  ;;  %v399_v56 = vadd.f32 %v395_v40, %v385_v50  ;;  %v523_v40 = vstv %s2388_s5  ;;  %v954_v46 = vmul.f32 %v953_v39, %v2367_v6  ;;  %s2481_s5 = sld [smem:[#allocation3 + $0x43]] }
 0x163   : > { %852 = vrot.lane.b32.xlu0 %v848_v43, %s1955_s29  ;;  %840 = vrot.lane.b32.xlu1 %v835_v44, %s1954_s24  ;;  %v524_v49 = vmul.f32 %v523_v40, %v2200_v38  ;;  %v525_v38 = vmul.f32 %v523_v40, %v2206_v42  ;;  %v1003_v42 = vstv %s2411_s28  ;;  %s2497_s28 = sld [smem:[#allocation3 + $0x45]] }
 0x165   : > { %v409_v52 = vpop.permute.xlu1 %408  ;;  %v421_v53 = vpop.permute.xlu0 %420 }
 0x166   : > { %v426_v57 = vadd.f32 %v421_v53, %v412_v51  ;;  %v413_v59 = vadd.f32 %v409_v52, %v399_v56  ;;  %v967_v52 = vstv %s2395_s7  ;;  %s2488_s7 = sld [smem:[#allocation3 + $0x44]] }
 0x167   : > { %866 = vrot.lane.b32.xlu0 %v862_v47, %s1956_s3  ;;  %854 = vrot.lane.b32.xlu1 %v849_v54, %s1955_s29  ;;  %v968_v56 = vmul.f32 %v967_v52, %v2367_v6 }
 0x168   : > { %v434_v61 = vadd.f32 %v432_v55, %v426_v57  ;;  %v955_v57 = vmul.f32 %v953_v39, %v2377_v22 }
 0x169   : > { %v423_v63 = vpop.permute.xlu1 %422  ;;  %v443_v0 = vpop.permute.xlu0 %442 }
 0x16a   : > { %v427_v5 = vadd.f32 %v423_v63, %v413_v59  ;;  %v448_v21 = vadd.f32 %v443_v0, %v434_v61  ;;  %v2418_v59 = vld [vmem:[#allocation2 + $0x19] sm:$0xff]  ;;  %v989_v61 = vstv %s2402_s19  ;;  %s2490_s19 = sld [smem:[#allocation3 + $0x23]] }
 0x16b   : > { %880 = vrot.lane.b32.xlu0 %v876_v3, %s1957_s14  ;;  %868 = vrot.lane.b32.xlu1 %v863_v4, %s1956_s3  ;;  %v990_v4 = vmul.f32 %v989_v61, %v2418_v59 }
 0x16c   : > { %v435_v8 = vadd.f32 %v433_v18, %v427_v5  ;;  %v969_v18 = vmul.f32 %v967_v52, %v2377_v22  ;;  %v2427_v5 = vld [vmem:[#allocation2 + $0x21] sm:$0xff] }
 0x16d   : > { %v445_v9 = vpop.permute.xlu1 %444  ;;  %v457_v10 = vpop.permute.xlu0 %456 }
 0x16e   : > { %v462_v28 = vadd.f32 %v457_v10, %v448_v21  ;;  %v449_v30 = vadd.f32 %v445_v9, %v435_v8  ;;  %v991_v9 = vmul.f32 %v989_v61, %v2427_v5  ;;  %v1004_v10 = vmul.f32 %v1003_v42, %v2418_v59 }
 0x16f   : > { %902 = vrot.lane.b32.xlu0 %v898_v11, %s1952_s8  ;;  %882 = vrot.lane.b32.xlu1 %v877_v62, %s1957_s14  ;;  %v1017_v11 = vstv %s2421_s27  ;;  %s2504_s27 = sld [smem:[#allocation3 + $0x47]] }
 0x171   : > { %v459_v14 = vpop.permute.xlu1 %458  ;;  %v471_v15 = vpop.permute.xlu0 %470 }
 0x172   : > { %v476_v31 = vadd.f32 %v471_v15, %v462_v28  ;;  %v463_v36 = vadd.f32 %v459_v14, %v449_v30  ;;  %v1005_v15 = vmul.f32 %v1003_v42, %v2427_v5  ;;  %v1032_v28 = vmul.f32 %v1031_v19, %v2418_v59 }
 0x173   : > { %916 = vrot.lane.b32.xlu0 %v912_v16, %s1953_s25  ;;  %904 = vrot.lane.b32.xlu1 %v899_v17, %s1952_s8  ;;  %v1018_v16 = vmul.f32 %v1017_v11, %v2418_v59 }
 0x175   : > { %v473_v2 = vpop.permute.xlu1 %472  ;;  %v485_v24 = vpop.permute.xlu0 %484 }
 0x176   : > { %v490_v37 = vadd.f32 %v485_v24, %v476_v31  ;;  %v477_v41 = vadd.f32 %v473_v2, %v463_v36  ;;  %v1045_v31 = vstv %s2437_s4  ;;  %s2523_s4 = sld [smem:[#allocation3 + $0x49]] }
 0x177   : > { %930 = vrot.lane.b32.xlu0 %v926_v25, %s1954_s24  ;;  %918 = vrot.lane.b32.xlu1 %v913_v26, %s1953_s25  ;;  %v1019_v26 = vmul.f32 %v1017_v11, %v2427_v5  ;;  %v1046_v39 = vmul.f32 %v1045_v31, %v2418_v59  ;;  %v1123_v11 = vstv %s2481_s5  ;;  %s2564_s5 = sld [smem:[#allocation3 + $0x4f]] }
 0x179   : > { %v487_v32 = vpop.permute.xlu1 %486  ;;  %v499_v33 = vpop.permute.xlu0 %498 }
 0x17a   : > { %v504_v43 = vadd.f32 %v499_v33, %v490_v37  ;;  %v491_v50 = vadd.f32 %v487_v32, %v477_v41  ;;  %v615_v32 = vstv %s2439_s16  ;;  %v1033_v37 = vmul.f32 %v1031_v19, %v2427_v5  ;;  %s2532_s16 = sld [smem:[#allocation3 + $0x4a]] }
 0x17b   : > { %944 = vrot.lane.b32.xlu0 %v940_v34, %s1955_s29  ;;  %932 = vrot.lane.b32.xlu1 %v927_v35, %s1954_s24  ;;  %v616_v40 = vmul.f32 %v615_v32, %v2228_v60  ;;  %v617_v60 = vmul.f32 %v615_v32, %v2234_v1  ;;  %v1095_v1 = vstv %s2462_s23  ;;  %s2548_s23 = sld [smem:[#allocation3 + $0x4c]] }
 0x17d   : > { %v501_v44 = vpop.permute.xlu1 %500  ;;  %v513_v45 = vpop.permute.xlu0 %512 }
 0x17e   : > { %v518_v51 = vadd.f32 %v513_v45, %v504_v43  ;;  %v505_v53 = vadd.f32 %v501_v44, %v491_v50  ;;  %v1059_v44 = vstv %s2446_s17  ;;  %v1047_v50 = vmul.f32 %v1045_v31, %v2427_v5  ;;  %s2539_s17 = sld [smem:[#allocation3 + $0x4b]] }
 0x17f   : > { %958 = vrot.lane.b32.xlu0 %v954_v46, %s1956_s3  ;;  %946 = vrot.lane.b32.xlu1 %v941_v48, %s1955_s29 }
 0x180   : > { %v526_v47 = vadd.f32 %v524_v49, %v518_v51  ;;  %v1060_v51 = vmul.f32 %v1059_v44, %v2418_v59 }
 0x181   : > { %v515_v54 = vpop.permute.xlu1 %514  ;;  %v535_v55 = vpop.permute.xlu0 %534 }
 0x182   : > { %v519_v58 = vadd.f32 %v515_v54, %v505_v53  ;;  %v540_v62 = vadd.f32 %v535_v55, %v526_v47  ;;  %v2469_v53 = vld [vmem:[#allocation2 + $0x1a] sm:$0xff]  ;;  %v1081_v47 = vstv %s2453_s20  ;;  %s2541_s20 = sld [smem:[#allocation3 + $0x2a]] }
 0x183   : > { %972 = vrot.lane.b32.xlu0 %v968_v56, %s1957_s14  ;;  %960 = vrot.lane.b32.xlu1 %v955_v57, %s1956_s3  ;;  %v1061_v57 = vmul.f32 %v1059_v44, %v2427_v5 }
 0x184   : > { %v527_v63 = vadd.f32 %v525_v38, %v519_v58  ;;  %v1082_v38 = vmul.f32 %v1081_v47, %v2469_v53  ;;  %v2478_v58 = vld [vmem:[#allocation2 + $0x22] sm:$0xff] }
 0x185   : > { %v537_v0 = vpop.permute.xlu1 %536  ;;  %v549_v3 = vpop.permute.xlu0 %548 }
 0x186   : > { %v554_v17 = vadd.f32 %v549_v3, %v540_v62  ;;  %v541_v21 = vadd.f32 %v537_v0, %v527_v63  ;;  %v1083_v0 = vmul.f32 %v1081_v47, %v2478_v58  ;;  %v1096_v3 = vmul.f32 %v1095_v1, %v2469_v53 }
 0x187   : > { %994 = vrot.lane.b32.xlu0 %v990_v4, %s1952_s8  ;;  %974 = vrot.lane.b32.xlu1 %v969_v18, %s1957_s14  ;;  %v1109_v4 = vstv %s2472_s26  ;;  %s2555_s26 = sld [smem:[#allocation3 + $0x4e]] }
 0x189   : > { %v551_v7 = vpop.permute.xlu1 %550  ;;  %v563_v8 = vpop.permute.xlu0 %562 }
 0x18a   : > { %v568_v2 = vadd.f32 %v563_v8, %v554_v17  ;;  %v555_v29 = vadd.f32 %v551_v7, %v541_v21  ;;  %v1097_v8 = vmul.f32 %v1095_v1, %v2478_v58  ;;  %v1124_v17 = vmul.f32 %v1123_v11, %v2469_v53 }
 0x18b   : > { %996 = vrot.lane.b32.xlu1 %v991_v9, %s1952_s8  ;;  %1008 = vrot.lane.b32.xlu0 %v1004_v10, %s1953_s25  ;;  %v1110_v9 = vmul.f32 %v1109_v4, %v2469_v53 }
 0x18d   : > { %v565_v13 = vpop.permute.xlu1 %564  ;;  %v577_v14 = vpop.permute.xlu0 %576 }
 0x18e   : > { %v582_v30 = vadd.f32 %v577_v14, %v568_v2  ;;  %v569_v33 = vadd.f32 %v565_v13, %v555_v29  ;;  %v1137_v2 = vstv %s2488_s7  ;;  %s2574_s7 = sld [smem:[#allocation3 + $0x50]] }
 0x18f   : > { %1010 = vrot.lane.b32.xlu1 %v1005_v15, %s1953_s25  ;;  %1022 = vrot.lane.b32.xlu0 %v1018_v16, %s1954_s24  ;;  %v1111_v16 = vmul.f32 %v1109_v4, %v2478_v58  ;;  %v1138_v31 = vmul.f32 %v1137_v2, %v2469_v53  ;;  %v1215_v4 = vstv %s2532_s16  ;;  %s2615_s16 = sld [smem:[#allocation3 + $0x56]] }
 0x191   : > { %v579_v24 = vpop.permute.xlu1 %578  ;;  %v591_v25 = vpop.permute.xlu0 %590 }
 0x192   : > { %v596_v34 = vadd.f32 %v591_v25, %v582_v30  ;;  %v583_v41 = vadd.f32 %v579_v24, %v569_v33  ;;  %v707_v24 = vstv %s2490_s19  ;;  %v1125_v30 = vmul.f32 %v1123_v11, %v2478_v58  ;;  %s2583_s19 = sld [smem:[#allocation3 + $0x51]] }
 0x193   : > { %1024 = vrot.lane.b32.xlu1 %v1019_v26, %s1954_s24  ;;  %1036 = vrot.lane.b32.xlu0 %v1032_v28, %s1955_s29  ;;  %v708_v32 = vmul.f32 %v707_v24, %v2262_v20  ;;  %v709_v20 = vmul.f32 %v707_v24, %v2271_v27  ;;  %v1187_v27 = vstv %s2513_s30  ;;  %s2599_s30 = sld [smem:[#allocation3 + $0x53]] }
 0x195   : > { %v593_v35 = vpop.permute.xlu1 %592  ;;  %v605_v36 = vpop.permute.xlu0 %604 }
 0x196   : > { %v610_v43 = vadd.f32 %v605_v36, %v596_v34  ;;  %v597_v45 = vadd.f32 %v593_v35, %v583_v41  ;;  %v1151_v35 = vstv %s2497_s28  ;;  %v1139_v41 = vmul.f32 %v1137_v2, %v2478_v58  ;;  %s2590_s28 = sld [smem:[#allocation3 + $0x52]] }
 0x197   : > { %1038 = vrot.lane.b32.xlu1 %v1033_v37, %s1955_s29  ;;  %1050 = vrot.lane.b32.xlu0 %v1046_v39, %s1956_s3 }
 0x198   : > { %v618_v46 = vadd.f32 %v616_v40, %v610_v43  ;;  %v1152_v43 = vmul.f32 %v1151_v35, %v2469_v53 }
 0x199   : > { %v607_v48 = vpop.permute.xlu1 %606  ;;  %v627_v49 = vpop.permute.xlu0 %626 }
 0x19a   : > { %v611_v52 = vadd.f32 %v607_v48, %v597_v45  ;;  %v632_v18 = vadd.f32 %v627_v49, %v618_v46  ;;  %v2520_v45 = vld [vmem:[#allocation2 + $0x1b] sm:$0xff]  ;;  %v1173_v46 = vstv %s2504_s27  ;;  %s2594_s27 = sld [smem:[#allocation3 + $0x31]] }
 0x19b   : > { %1052 = vrot.lane.b32.xlu1 %v1047_v50, %s1956_s3  ;;  %1064 = vrot.lane.b32.xlu0 %v1060_v51, %s1957_s14  ;;  %v1153_v51 = vmul.f32 %v1151_v35, %v2478_v58 }
 0x19c   : > { %v619_v54 = vadd.f32 %v617_v60, %v611_v52  ;;  %v1174_v60 = vmul.f32 %v1173_v46, %v2520_v45  ;;  %v2529_v52 = vld [vmem:[#allocation2 + $0x23] sm:$0xff] }
 0x19d   : > { %v629_v55 = vpop.permute.xlu1 %628  ;;  %v641_v56 = vpop.permute.xlu0 %640 }
 0x19e   : > { %v646_v10 = vadd.f32 %v641_v56, %v632_v18  ;;  %v633_v62 = vadd.f32 %v629_v55, %v619_v54  ;;  %v1175_v55 = vmul.f32 %v1173_v46, %v2529_v52  ;;  %v1188_v56 = vmul.f32 %v1187_v27, %v2520_v45 }
 0x19f   : > { %1066 = vrot.lane.b32.xlu1 %v1061_v57, %s1957_s14  ;;  %1086 = vrot.lane.b32.xlu0 %v1082_v38, %s1952_s8  ;;  %v1201_v57 = vstv %s2523_s4  ;;  %s2606_s4 = sld [smem:[#allocation3 + $0x55]] }
 0x1a1   : > { %v643_v61 = vpop.permute.xlu1 %642  ;;  %v655_v63 = vpop.permute.xlu0 %654 }
 0x1a2   : > { %v660_v13 = vadd.f32 %v655_v63, %v646_v10  ;;  %v647_v19 = vadd.f32 %v643_v61, %v633_v62  ;;  %v1189_v63 = vmul.f32 %v1187_v27, %v2529_v52  ;;  %v1216_v10 = vmul.f32 %v1215_v4, %v2520_v45 }
 0x1a3   : > { %1088 = vrot.lane.b32.xlu1 %v1083_v0, %s1952_s8  ;;  %1100 = vrot.lane.b32.xlu0 %v1096_v3, %s1953_s25  ;;  %v1202_v0 = vmul.f32 %v1201_v57, %v2520_v45 }
 0x1a5   : > { %v657_v42 = vpop.permute.xlu1 %656  ;;  %v669_v7 = vpop.permute.xlu0 %668 }
 0x1a6   : > { %v674_v21 = vadd.f32 %v669_v7, %v660_v13  ;;  %v661_v25 = vadd.f32 %v657_v42, %v647_v19  ;;  %v1229_v13 = vstv %s2539_s17  ;;  %s2625_s17 = sld [smem:[#allocation3 + $0x57]] }
 0x1a7   : > { %1102 = vrot.lane.b32.xlu1 %v1097_v8, %s1953_s25  ;;  %1114 = vrot.lane.b32.xlu0 %v1110_v9, %s1954_s24  ;;  %v1203_v9 = vmul.f32 %v1201_v57, %v2529_v52  ;;  %v1230_v2 = vmul.f32 %v1229_v13, %v2520_v45 }
 0x1a9   : > { %v671_v14 = vpop.permute.xlu1 %670  ;;  %v683_v15 = vpop.permute.xlu0 %682 }
 0x1aa   : > { %v688_v26 = vadd.f32 %v683_v15, %v674_v21  ;;  %v675_v33 = vadd.f32 %v671_v14, %v661_v25  ;;  %v799_v14 = vstv %s2541_s20  ;;  %v1217_v21 = vmul.f32 %v1215_v4, %v2529_v52  ;;  %s2634_s20 = sld [smem:[#allocation3 + $0x58]] }
 0x1ab   : > { %1116 = vrot.lane.b32.xlu1 %v1111_v16, %s1954_s24  ;;  %1128 = vrot.lane.b32.xlu0 %v1124_v17, %s1955_s29  ;;  %v800_v24 = vmul.f32 %v799_v14, %v2316_v12  ;;  %v801_v12 = vmul.f32 %v799_v14, %v2325_v23 }
 0x1ad   : > { %v685_v28 = vpop.permute.xlu1 %684  ;;  %v697_v29 = vpop.permute.xlu0 %696 }
 0x1ae   : > { %v702_v34 = vadd.f32 %v697_v29, %v688_v26  ;;  %v689_v36 = vadd.f32 %v685_v28, %v675_v33  ;;  %v1243_v28 = vstv %s2548_s23  ;;  %v1231_v33 = vmul.f32 %v1229_v13, %v2529_v52  ;;  %s2641_s23 = sld [smem:[#allocation3 + $0x59]] }
 0x1af   : > { %1130 = vrot.lane.b32.xlu1 %v1125_v30, %s1955_s29  ;;  %1142 = vrot.lane.b32.xlu0 %v1138_v31, %s1956_s3 }
 0x1b0   : > { %v710_v37 = vadd.f32 %v708_v32, %v702_v34  ;;  %v1244_v34 = vmul.f32 %v1243_v28, %v2520_v45 }
 0x1b1   : > { %v699_v39 = vpop.permute.xlu1 %698  ;;  %v719_v40 = vpop.permute.xlu0 %718 }
 0x1b2   : > { %v703_v44 = vadd.f32 %v699_v39, %v689_v36  ;;  %v724_v38 = vadd.f32 %v719_v40, %v710_v37  ;;  %v2571_v37 = vld [vmem:[#allocation2 + $0x1c] sm:$0xff]  ;;  %v1265_v39 = vstv %s2555_s26  ;;  %s2645_s26 = sld [smem:[#allocation3 + $0x38]] }
 0x1b3   : > { %1144 = vrot.lane.b32.xlu1 %v1139_v41, %s1956_s3  ;;  %1156 = vrot.lane.b32.xlu0 %v1152_v43, %s1957_s14  ;;  %v1266_v23 = vmul.f32 %v1265_v39, %v2571_v37 }
 0x1b4   : > { %v711_v48 = vadd.f32 %v709_v20, %v703_v44  ;;  %v1245_v20 = vmul.f32 %v1243_v28, %v2529_v52 }
 0x1b5   : > { %v721_v49 = vpop.permute.xlu1 %720  ;;  %v733_v50 = vpop.permute.xlu0 %732 }
 0x1b6   : > { %v738_v3 = vadd.f32 %v733_v50, %v724_v38  ;;  %v725_v18 = vadd.f32 %v721_v49, %v711_v48  ;;  %v2580_v48 = vld [vmem:[#allocation2 + $0x24] sm:$0xff]  ;;  %v1279_v49 = vstv %s2564_s5  ;;  %s2650_s5 = sld [smem:[#allocation3 + $0x5a]] }
 0x1b7   : > { %1158 = vrot.lane.b32.xlu1 %v1153_v51, %s1957_s14  ;;  %1178 = vrot.lane.b32.xlu0 %v1174_v60, %s1952_s8  ;;  %v1267_v60 = vmul.f32 %v1265_v39, %v2580_v48  ;;  %v1280_v27 = vmul.f32 %v1279_v49, %v2571_v37  ;;  %v1281_v38 = vmul.f32 %v1279_v49, %v2580_v48  ;;  %v2631_v39 = vld [vmem:[#allocation2 + $0x25] sm:$0xff]  ;;  %v1385_v49 = vstv %s2625_s17 }
 0x1b9   : > { %v735_v47 = vpop.permute.xlu1 %734  ;;  %v747_v54 = vpop.permute.xlu0 %746 }
 0x1ba   : > { %v752_v42 = vadd.f32 %v747_v54, %v738_v3  ;;  %v739_v11 = vadd.f32 %v735_v47, %v725_v18 }
 0x1bb   : > { %1180 = vrot.lane.b32.xlu1 %v1175_v55, %s1952_s8  ;;  %1192 = vrot.lane.b32.xlu0 %v1188_v56, %s1953_s25  ;;  %v1293_v55 = vstv %s2574_s7  ;;  %s2657_s7 = sld [smem:[#allocation3 + $0x5c]] }
 0x1bc   : > { %v1295_v18 = vmul.f32 %v1293_v55, %v2580_v48 }
 0x1bd   : > { %v749_v1 = vpop.permute.xlu1 %748  ;;  %v761_v61 = vpop.permute.xlu0 %760 }
 0x1be   : > { %v766_v62 = vadd.f32 %v761_v61, %v752_v42  ;;  %v753_v15 = vadd.f32 %v749_v1, %v739_v11  ;;  %v1294_v1 = vmul.f32 %v1293_v55, %v2571_v37  ;;  %v1399_v55 = vstv %s2634_s20 }
 0x1bf   : > { %1194 = vrot.lane.b32.xlu1 %v1189_v63, %s1953_s25  ;;  %1206 = vrot.lane.b32.xlu0 %v1202_v0, %s1954_s24  ;;  %v1307_v0 = vstv %s2583_s19  ;;  %s2666_s19 = sld [smem:[#allocation3 + $0x5d]] }
 0x1c0   : > { %v1308_v42 = vmul.f32 %v1307_v0, %v2571_v37  ;;  %v1309_v13 = vmul.f32 %v1307_v0, %v2580_v48  ;;  %v983_v0 = vstv %s2645_s26 }
 0x1c1   : > { %v763_v7 = vpop.permute.xlu1 %762  ;;  %v775_v8 = vpop.permute.xlu0 %774 }
 0x1c2   : > { %v780_v16 = vadd.f32 %v775_v8, %v766_v62  ;;  %v767_v25 = vadd.f32 %v763_v7, %v753_v15 }
 0x1c3   : > { %1208 = vrot.lane.b32.xlu1 %v1203_v9, %s1954_s24  ;;  %1220 = vrot.lane.b32.xlu0 %v1216_v10, %s1955_s29  ;;  %v1321_v9 = vstv %s2590_s28  ;;  %v891_v10 = vstv %s2594_s27  ;;  %s2676_s28 = sld [smem:[#allocation3 + $0x5e]] }
 0x1c4   : > { %v1322_v14 = vmul.f32 %v1321_v9, %v2571_v37  ;;  %v893_v28 = vmul.f32 %v891_v10, %v2377_v22  ;;  %s2685_s27 = sld [smem:[#allocation3 + $0x5f]] }
 0x1c5   : > { %v777_v17 = vpop.permute.xlu1 %776  ;;  %v789_v19 = vpop.permute.xlu0 %788 }
 0x1c6   : > { %v794_v26 = vadd.f32 %v789_v19, %v780_v16  ;;  %v781_v29 = vadd.f32 %v777_v17, %v767_v25  ;;  %v892_v16 = vmul.f32 %v891_v10, %v2367_v6  ;;  %v1335_v19 = vstv %s2599_s30  ;;  %s2692_s30 = sld [smem:[#allocation3 + $0x60]] }
 0x1c7   : > { %1222 = vrot.lane.b32.xlu1 %v1217_v21, %s1955_s29  ;;  %1234 = vrot.lane.b32.xlu0 %v1230_v2, %s1956_s3  ;;  %v1323_v25 = vmul.f32 %v1321_v9, %v2580_v48  ;;  %v1427_v10 = vstv %s2650_s5 }
 0x1c8   : > { %v802_v30 = vadd.f32 %v800_v24, %v794_v26  ;;  %v1336_v26 = vmul.f32 %v1335_v19, %v2571_v37 }
 0x1c9   : > { %v791_v31 = vpop.permute.xlu1 %790  ;;  %v811_v32 = vpop.permute.xlu0 %810 }
 0x1ca   : > { %v795_v35 = vadd.f32 %v791_v31, %v781_v29  ;;  %v816_v36 = vadd.f32 %v811_v32, %v802_v30  ;;  %v2622_v30 = vld [vmem:[#allocation2 + $0x1d] sm:$0xff]  ;;  %v1357_v31 = vstv %s2606_s4  ;;  %s2696_s4 = sld [smem:[#allocation3 + $0x3f]] }
 0x1cb   : > { %1236 = vrot.lane.b32.xlu1 %v1231_v33, %s1956_s3  ;;  %1248 = vrot.lane.b32.xlu0 %v1244_v34, %s1957_s14  ;;  %v1358_v22 = vmul.f32 %v1357_v31, %v2622_v30 }
 0x1cc   : > { %v803_v40 = vadd.f32 %v801_v12, %v795_v35  ;;  %v1337_v12 = vmul.f32 %v1335_v19, %v2580_v48  ;;  %v2673_v19 = vld [vmem:[#allocation2 + $0x1e] sm:$0xff] }
 0x1cd   : > { %v813_v41 = vpop.permute.xlu1 %812  ;;  %v825_v43 = vpop.permute.xlu0 %824 }
 0x1ce   : > { %v817_v44 = vadd.f32 %v813_v41, %v803_v40  ;;  %v830_v46 = vadd.f32 %v825_v43, %v816_v36  ;;  %v1371_v40 = vstv %s2615_s16  ;;  %s2701_s16 = sld [smem:[#allocation3 + $0x61]] }
 0x1cf   : > { %1250 = vrot.lane.b32.xlu1 %v1245_v20, %s1957_s14  ;;  %1270 = vrot.lane.b32.xlu0 %v1266_v23, %s1952_s8  ;;  %v1359_v20 = vmul.f32 %v1357_v31, %v2631_v39  ;;  %v1372_v23 = vmul.f32 %v1371_v40, %v2622_v30 }
 0x1d1   : > { %v827_v50 = vpop.permute.xlu1 %826  ;;  %v839_v51 = vpop.permute.xlu0 %838 }
 0x1d2   : > { %v831_v47 = vadd.f32 %v827_v50, %v817_v44  ;;  %v844_v54 = vadd.f32 %v839_v51, %v830_v46 }
 0x1d3   : > { %1272 = vrot.lane.b32.xlu1 %v1267_v60, %s1952_s8  ;;  %1284 = vrot.lane.b32.xlu0 %v1280_v27, %s1953_s25  ;;  %v1373_v60 = vmul.f32 %v1371_v40, %v2631_v39  ;;  %v1386_v27 = vmul.f32 %v1385_v49, %v2622_v30 }
 0x1d5   : > { %v841_v56 = vpop.permute.xlu1 %840  ;;  %v853_v57 = vpop.permute.xlu0 %852 }
 0x1d6   : > { %v845_v61 = vadd.f32 %v841_v56, %v831_v47  ;;  %v858_v63 = vadd.f32 %v853_v57, %v844_v54 }
 0x1d7   : > { %1286 = vrot.lane.b32.xlu1 %v1281_v38, %s1953_s25  ;;  %1298 = vrot.lane.b32.xlu0 %v1294_v1, %s1954_s24  ;;  %v1387_v38 = vmul.f32 %v1385_v49, %v2631_v39  ;;  %v1400_v1 = vmul.f32 %v1399_v55, %v2622_v30 }
 0x1d9   : > { %v855_v3 = vpop.permute.xlu1 %854  ;;  %v867_v4 = vpop.permute.xlu0 %866 }
 0x1da   : > { %v859_v7 = vadd.f32 %v855_v3, %v845_v61  ;;  %v872_v8 = vadd.f32 %v867_v4, %v858_v63  ;;  %v1413_v63 = vstv %s2641_s23 }
 0x1db   : > { %1300 = vrot.lane.b32.xlu1 %v1295_v18, %s1954_s24  ;;  %1312 = vrot.lane.b32.xlu0 %v1308_v42, %s1955_s29  ;;  %v1401_v42 = vmul.f32 %v1399_v55, %v2631_v39 }
 0x1dd   : > { %v869_v11 = vpop.permute.xlu1 %868  ;;  %v881_v62 = vpop.permute.xlu0 %880 }
 0x1de   : > { %v873_v15 = vadd.f32 %v869_v11, %v859_v7  ;;  %v886_v17 = vadd.f32 %v881_v62, %v872_v8  ;;  %v1414_v7 = vmul.f32 %v1413_v63, %v2622_v30  ;;  %v984_v8 = vmul.f32 %v983_v0, %v2418_v59 }
 0x1df   : > { %1314 = vrot.lane.b32.xlu1 %v1309_v13, %s1955_s29  ;;  %1326 = vrot.lane.b32.xlu0 %v1322_v14, %s1956_s3 }
 0x1e0   : > { %v894_v21 = vadd.f32 %v892_v16, %v886_v17  ;;  %v1428_v16 = vmul.f32 %v1427_v10, %v2622_v30  ;;  %v985_v17 = vmul.f32 %v983_v0, %v2427_v5  ;;  %v1463_v5 = vstv %s2666_s19  ;;  %s1958_s19 = smov [#allocation8]  }
 0x1e1   : > { %v883_v2 = vpop.permute.xlu1 %882  ;;  %v903_v24 = vpop.permute.xlu0 %902 }
 0x1e2   : > { %v887_v29 = vadd.f32 %v883_v2, %v873_v15  ;;  %v908_v6 = vadd.f32 %v903_v24, %v894_v21  ;;  %v1415_v15 = vmul.f32 %v1413_v63, %v2631_v39  ;;  %v1449_v21 = vstv %s2657_s7  ;;  %s1547_s7 = scalar_lea.sflag [#allocation5], %s2092_s6 }
 0x1e3   : > { %1328 = vrot.lane.b32.xlu1 %v1323_v25, %s1956_s3  ;;  %1340 = vrot.lane.b32.xlu0 %v1336_v26, %s1957_s14  ;;  %v1429_v26 = vmul.f32 %v1427_v10, %v2631_v39 }
 0x1e4   : > { %v895_v32 = vadd.f32 %v893_v28, %v887_v29  ;;  %v1450_v28 = vmul.f32 %v1449_v21, %v2673_v19  ;;  %v2682_v29 = vld [vmem:[#allocation2 + $0x26] sm:$0xff] }
 0x1e5   : > { %v905_v33 = vpop.permute.xlu1 %904  ;;  %v917_v34 = vpop.permute.xlu0 %916 }
 0x1e6   : > { %v909_v35 = vadd.f32 %v905_v33, %v895_v32  ;;  %v922_v36 = vadd.f32 %v917_v34, %v908_v6  ;;  %v1451_v32 = vmul.f32 %v1449_v21, %v2682_v29  ;;  %v1464_v33 = vmul.f32 %v1463_v5, %v2673_v19 }
 0x1e7   : > { %1342 = vrot.lane.b32.xlu1 %v1337_v12, %s1957_s14  ;;  %1362 = vrot.lane.b32.xlu0 %v1358_v22, %s1952_s8  ;;  %v1477_v34 = vstv %s2676_s28  ;;  %s1880_s28 = sshll.u32 %s1958_s19, 4  ;;  %s1881_s28 = int_to_ptr.vmem [resolvable:$false] %s1880_s28 }
 0x1e8   : > { %v1478_v40 = vmul.f32 %v1477_v34, %v2673_v19  ;;  %v1479_v49 = vmul.f32 %v1477_v34, %v2682_v29 }
 0x1e9   : > { %v919_v41 = vpop.permute.xlu1 %918  ;;  %v931_v43 = vpop.permute.xlu0 %930 }
 0x1ea   : > { %v923_v44 = vadd.f32 %v919_v41, %v909_v35  ;;  %v936_v46 = vadd.f32 %v931_v43, %v922_v36  ;;  %v1465_v36 = vmul.f32 %v1463_v5, %v2682_v29  ;;  %v1491_v43 = vstv %s2685_s27  ;;  %s1882_s27 = scalar_lea.vmem %s1881_s28, 512 }
 0x1eb   : > { %1364 = vrot.lane.b32.xlu1 %v1359_v20, %s1952_s8  ;;  %1376 = vrot.lane.b32.xlu0 %v1372_v23, %s1953_s25 }
 0x1ed   : > { %v933_v50 = vpop.permute.xlu1 %932  ;;  %v945_v51 = vpop.permute.xlu0 %944 }
 0x1ee   : > { %v937_v47 = vadd.f32 %v933_v50, %v923_v44  ;;  %v950_v54 = vadd.f32 %v945_v51, %v936_v46  ;;  %v1492_v50 = vmul.f32 %v1491_v43, %v2673_v19 }
 0x1ef   : > { %1378 = vrot.lane.b32.xlu1 %v1373_v60, %s1953_s25  ;;  %1390 = vrot.lane.b32.xlu0 %v1386_v27, %s1954_s24  ;;  %v1505_v27 = vstv %s2692_s30 }
 0x1f1   : > { %v947_v56 = vpop.permute.xlu1 %946  ;;  %v959_v57 = vpop.permute.xlu0 %958 }
 0x1f2   : > { %v951_v61 = vadd.f32 %v947_v56, %v937_v47  ;;  %v964_v3 = vadd.f32 %v959_v57, %v950_v54  ;;  %v1075_v47 = vstv %s2696_s4 }
 0x1f3   : > { %1392 = vrot.lane.b32.xlu1 %v1387_v38, %s1954_s24  ;;  %1404 = vrot.lane.b32.xlu0 %v1400_v1, %s1955_s29  ;;  %v1493_v38 = vmul.f32 %v1491_v43, %v2682_v29  ;;  %v1506_v1 = vmul.f32 %v1505_v27, %v2673_v19  ;;  %v1076_v63 = vmul.f32 %v1075_v47, %v2469_v53 }
 0x1f4   : > { %v1077_v10 = vmul.f32 %v1075_v47, %v2478_v58 }
 0x1f5   : > { %v961_v4 = vpop.permute.xlu1 %960  ;;  %v973_v18 = vpop.permute.xlu0 %972 }
 0x1f6   : > { %v978_v9 = vadd.f32 %v973_v18, %v964_v3  ;;  %v965_v11 = vadd.f32 %v961_v4, %v951_v61  ;;  %v1519_v3 = vstv %s2701_s16 }
 0x1f7   : > { %1406 = vrot.lane.b32.xlu1 %v1401_v42, %s1955_s29  ;;  %1418 = vrot.lane.b32.xlu0 %v1414_v7, %s1956_s3 }
 0x1f8   : > { %v986_v62 = vadd.f32 %v984_v8, %v978_v9  ;;  %v1507_v8 = vmul.f32 %v1505_v27, %v2682_v29  ;;  %v1520_v9 = vmul.f32 %v1519_v3, %v2673_v19 }
 0x1f9   : > { %v975_v13 = vpop.permute.xlu1 %974  ;;  %v995_v14 = vpop.permute.xlu0 %994 }
 0x1fa   : > { %v979_v59 = vadd.f32 %v975_v13, %v965_v11  ;;  %v1000_v12 = vadd.f32 %v995_v14, %v986_v62  ;;  %v1521_v14 = vmul.f32 %v1519_v3, %v2682_v29 }
 0x1fb   : > { %1420 = vrot.lane.b32.xlu1 %v1415_v15, %s1956_s3  ;;  %1432 = vrot.lane.b32.xlu0 %v1428_v16, %s1957_s14 }
 0x1fc   : > { %v987_v2 = vadd.f32 %v985_v17, %v979_v59 }
 0x1fd   : > { %v997_v24 = vpop.permute.xlu1 %996  ;;  %v1009_v25 = vpop.permute.xlu0 %1008 }
 0x1fe   : > { %v1014_v41 = vadd.f32 %v1009_v25, %v1000_v12  ;;  %v1001_v20 = vadd.f32 %v997_v24, %v987_v2 }
 0x1ff   : > { %1434 = vrot.lane.b32.xlu1 %v1429_v26, %s1957_s14  ;;  %1454 = vrot.lane.b32.xlu0 %v1450_v28, %s1952_s8 }
 0x201   : > { %v1011_v6 = vpop.permute.xlu1 %1010  ;;  %v1023_v31 = vpop.permute.xlu0 %1022 }
 0x202   : > { %v1028_v23 = vadd.f32 %v1023_v31, %v1014_v41  ;;  %v1015_v51 = vadd.f32 %v1011_v6, %v1001_v20 }
 0x203   : > { %1456 = vrot.lane.b32.xlu1 %v1451_v32, %s1952_s8  ;;  %1468 = vrot.lane.b32.xlu0 %v1464_v33, %s1953_s25  ;;  %s1725_s8 = sld [smem:[#allocation3 + $0x46]] }
 0x205   : > { %v1025_v22 = vpop.permute.xlu1 %1024  ;;  %v1037_v35 = vpop.permute.xlu0 %1036 }
 0x206   : > { %v1042_v60 = vadd.f32 %v1037_v35, %v1028_v23  ;;  %v1029_v54 = vadd.f32 %v1025_v22, %v1015_v51 }
 0x207   : > { %1470 = vrot.lane.b32.xlu1 %v1465_v36, %s1953_s25  ;;  %1482 = vrot.lane.b32.xlu0 %v1478_v40, %s1954_s24  ;;  %s1732_s25 = sld [smem:[#allocation3 + $0x4d]] }
 0x209   : > { %v1039_v44 = vpop.permute.xlu1 %1038  ;;  %v1051_v46 = vpop.permute.xlu0 %1050  ;;  %v1167_v6 = vstv %s1725_s8 }
 0x20a   : > { %v1056_v55 = vadd.f32 %v1051_v46, %v1042_v60  ;;  %v1043_v61 = vadd.f32 %v1039_v44, %v1029_v54  ;;  %v1168_v35 = vmul.f32 %v1167_v6, %v2520_v45  ;;  %v1169_v23 = vmul.f32 %v1167_v6, %v2529_v52 }
 0x20b   : > { %1484 = vrot.lane.b32.xlu1 %v1479_v49, %s1954_s24  ;;  %1496 = vrot.lane.b32.xlu0 %v1492_v50, %s1955_s29  ;;  %s1739_s24 = sld [smem:[#allocation3 + $0x54]] }
 0x20d   : > { %v1053_v56 = vpop.permute.xlu1 %1052  ;;  %v1065_v57 = vpop.permute.xlu0 %1064 }
 0x20e   : > { %v1070_v0 = vadd.f32 %v1065_v57, %v1056_v55  ;;  %v1057_v4 = vadd.f32 %v1053_v56, %v1043_v61  ;;  %v1259_v61 = vstv %s1732_s25 }
 0x20f   : > { %1498 = vrot.lane.b32.xlu1 %v1493_v38, %s1955_s29  ;;  %1510 = vrot.lane.b32.xlu0 %v1506_v1, %s1956_s3  ;;  %s1746_s29 = sld [smem:[#allocation3 + $0x5b]] }
 0x210   : > { %v1078_v18 = vadd.f32 %v1076_v63, %v1070_v0 }
 0x211   : > { %v1067_v42 = vpop.permute.xlu1 %1066  ;;  %v1087_v7 = vpop.permute.xlu0 %1086 }
 0x212   : > { %v1071_v11 = vadd.f32 %v1067_v42, %v1057_v4  ;;  %v1092_v17 = vadd.f32 %v1087_v7, %v1078_v18  ;;  %v1260_v42 = vmul.f32 %v1259_v61, %v2571_v37 }
 0x213   : > { %1512 = vrot.lane.b32.xlu1 %v1507_v8, %s1956_s3  ;;  %1524 = vrot.lane.b32.xlu0 %v1520_v9, %s1957_s14  ;;  %s1655_s3 = sshll.u32 %s2092_s6, 4 }
 0x214   : > { %v1079_v53 = vadd.f32 %v1077_v10, %v1071_v11  ;;  %s173_s17 = scalar_lea.vmem [#allocation8], %s1655_s3 }
 0x215   : > { %v1089_v62 = vpop.permute.xlu1 %1088  ;;  %v1101_v13 = vpop.permute.xlu0 %1100  ;;  %s1560_s20 = sshll.u32 %s173_s17, 4  ;;  %s2740_s20 = int_to_ptr.vmem [resolvable:$true] %s1560_s20 }
 0x216   : > { %v1106_v2 = vadd.f32 %v1101_v13, %v1092_v17  ;;  %v1093_v58 = vadd.f32 %v1089_v62, %v1079_v53  ;;  %v1261_v53 = vmul.f32 %v1259_v61, %v2580_v48  ;;  %p1883_p9 = scmp.lt.s32.totalorder %s2740_s20, %s1881_s28 }
 0x217   : > { %1526 = vrot.lane.b32.xlu1 %v1521_v14, %s1957_s14  ;;  %s1759_s14 = sshll.u32 %s1997_s13, 8  ;;  %s1876_s13 = scalar_lea.vmem %s2740_s20, 256 }
 0x218   : > { %s2738_s5 = scalar_lea.hbm %s2786_s2, %s1759_s14  ;;  %p1877_p12 = scmp.ne.s32.totalorder %s2740_s20, %s1876_s13 }
 0x219   : > { %v1103_v15 = vpop.permute.xlu1 %1102  ;;  %v1115_v16 = vpop.permute.xlu0 %1114  ;;  %p1884_p10 = scmp.lt.s32.totalorder %s1882_s27, %s1876_s13 }
 0x21a   : > { %v1120_v24 = vadd.f32 %v1115_v16, %v1106_v2  ;;  %v1107_v28 = vadd.f32 %v1103_v15, %v1093_v58  ;;  %p1878_p7 = pnand %p1877_p12, %p2802_p13 }
 0x21b   : > { %p1885_p2 = por %p1884_p10, %p1883_p9 }
 0x21c   : > { %p1879_p8 = pneg %p1878_p7 }
 0x21d   : > { %v1117_v59 = vpop.permute.xlu1 %1116  ;;  %v1129_v21 = vpop.permute.xlu0 %1128 }
 0x21e   : > { %v1134_v5 = vadd.f32 %v1129_v21, %v1120_v24  ;;  %v1121_v31 = vadd.f32 %v1117_v59, %v1107_v28  ;;  %p1886_p0 = pnand %p1885_p2, %p1879_p8 }
 0x221   : > { %v1131_v25 = vpop.permute.xlu1 %1130  ;;  %v1143_v26 = vpop.permute.xlu0 %1142 }
 0x222   : > { %v1148_v32 = vadd.f32 %v1143_v26, %v1134_v5  ;;  %v1135_v12 = vadd.f32 %v1131_v25, %v1121_v31  ;;  %v1351_v5 = vstv %s1739_s24 }
 0x225   : > { %v1145_v33 = vpop.permute.xlu1 %1144  ;;  %v1157_v34 = vpop.permute.xlu0 %1156 }
 0x226   : > { %v1162_v22 = vadd.f32 %v1157_v34, %v1148_v32  ;;  %v1149_v36 = vadd.f32 %v1145_v33, %v1135_v12  ;;  %v1352_v12 = vmul.f32 %v1351_v5, %v2622_v30 }
 0x228   : > { %v1170_v40 = vadd.f32 %v1168_v35, %v1162_v22 }
 0x229   : > { %v1159_v41 = vpop.permute.xlu1 %1158  ;;  %v1179_v43 = vpop.permute.xlu0 %1178 }
 0x22a   : > { %v1163_v20 = vadd.f32 %v1159_v41, %v1149_v36  ;;  %v1184_v60 = vadd.f32 %v1179_v43, %v1170_v40  ;;  %v1353_v43 = vmul.f32 %v1351_v5, %v2631_v39 }
 0x22c   : > { %v1171_v44 = vadd.f32 %v1169_v23, %v1163_v20 }
 0x22d   : > { %v1181_v46 = vpop.permute.xlu1 %1180  ;;  %v1193_v49 = vpop.permute.xlu0 %1192 }
 0x22e   : > { %v1198_v54 = vadd.f32 %v1193_v49, %v1184_v60  ;;  %v1185_v55 = vadd.f32 %v1181_v46, %v1171_v44 }
 0x231   : > { %v1195_v50 = vpop.permute.xlu1 %1194  ;;  %v1207_v51 = vpop.permute.xlu0 %1206 }
 0x232   : > { %v1212_v56 = vadd.f32 %v1207_v51, %v1198_v54  ;;  %v1199_v38 = vadd.f32 %v1195_v50, %v1185_v55 }
 0x235   : > { %v1209_v27 = vpop.permute.xlu1 %1208  ;;  %v1221_v47 = vpop.permute.xlu0 %1220 }
 0x236   : > { %v1226_v1 = vadd.f32 %v1221_v47, %v1212_v56  ;;  %v1213_v63 = vadd.f32 %v1209_v27, %v1199_v38 }
 0x239   : > { %v1223_v45 = vpop.permute.xlu1 %1222  ;;  %v1235_v57 = vpop.permute.xlu0 %1234 }
 0x23a   : > { %v1240_v0 = vadd.f32 %v1235_v57, %v1226_v1  ;;  %v1227_v4 = vadd.f32 %v1223_v45, %v1213_v63  ;;  %v1443_v57 = vstv %s1746_s29 }
 0x23d   : > { %v1237_v52 = vpop.permute.xlu1 %1236  ;;  %v1249_v3 = vpop.permute.xlu0 %1248 }
 0x23e   : > { %v1254_v18 = vadd.f32 %v1249_v3, %v1240_v0  ;;  %v1241_v7 = vadd.f32 %v1237_v52, %v1227_v4  ;;  %v1444_v52 = vmul.f32 %v1443_v57, %v2673_v19 }
 0x240   : > { %v1262_v8 = vadd.f32 %v1260_v42, %v1254_v18 }
 0x241   : > { %v1251_v9 = vpop.permute.xlu1 %1250  ;;  %v1271_v10 = vpop.permute.xlu0 %1270 }
 0x242   : > { %v1255_v11 = vadd.f32 %v1251_v9, %v1241_v7  ;;  %v1276_v17 = vadd.f32 %v1271_v10, %v1262_v8  ;;  %v1445_v8 = vmul.f32 %v1443_v57, %v2682_v29 }
 0x244   : > { %v1263_v62 = vadd.f32 %v1261_v53, %v1255_v11 }
 0x245   : > { %v1273_v13 = vpop.permute.xlu1 %1272  ;;  %v1285_v14 = vpop.permute.xlu0 %1284 }
 0x246   : > { %v1290_v2 = vadd.f32 %v1285_v14, %v1276_v17  ;;  %v1277_v58 = vadd.f32 %v1273_v13, %v1263_v62 }
 0x249   : > { %v1287_v15 = vpop.permute.xlu1 %1286  ;;  %v1299_v16 = vpop.permute.xlu0 %1298 }
 0x24a   : > { %v1304_v24 = vadd.f32 %v1299_v16, %v1290_v2  ;;  %v1291_v26 = vadd.f32 %v1287_v15, %v1277_v58 }
 0x24d   : > { %v1301_v59 = vpop.permute.xlu1 %1300  ;;  %v1313_v21 = vpop.permute.xlu0 %1312 }
 0x24e   : > { %v1318_v28 = vadd.f32 %v1313_v21, %v1304_v24  ;;  %v1305_v6 = vadd.f32 %v1301_v59, %v1291_v26 }
 0x251   : > { %v1315_v37 = vpop.permute.xlu1 %1314  ;;  %v1327_v25 = vpop.permute.xlu0 %1326 }
 0x252   : > { %v1332_v31 = vadd.f32 %v1327_v25, %v1318_v28  ;;  %v1319_v33 = vadd.f32 %v1315_v37, %v1305_v6 }
 0x255   : > { %v1329_v48 = vpop.permute.xlu1 %1328  ;;  %v1341_v32 = vpop.permute.xlu0 %1340 }
 0x256   : > { %v1346_v34 = vadd.f32 %v1341_v32, %v1332_v31  ;;  %v1333_v22 = vadd.f32 %v1329_v48, %v1319_v33 }
 0x258   : > { %v1354_v35 = vadd.f32 %v1352_v12, %v1346_v34 }
 0x259   : > { %v1343_v36 = vpop.permute.xlu1 %1342  ;;  %v1363_v40 = vpop.permute.xlu0 %1362 }
 0x25a   : > { %v1347_v41 = vadd.f32 %v1343_v36, %v1333_v22  ;;  %v1368_v50 = vadd.f32 %v1363_v40, %v1354_v35 }
 0x25c   : > { %v1355_v20 = vadd.f32 %v1353_v43, %v1347_v41 }
 0x25d   : > { %v1365_v23 = vpop.permute.xlu1 %1364  ;;  %v1377_v44 = vpop.permute.xlu0 %1376 }
 0x25e   : > { %v1382_v27 = vadd.f32 %v1377_v44, %v1368_v50  ;;  %v1369_v47 = vadd.f32 %v1365_v23, %v1355_v20 }
 0x261   : > { %v1379_v46 = vpop.permute.xlu1 %1378  ;;  %v1391_v49 = vpop.permute.xlu0 %1390 }
 0x262   : > { %v1396_v54 = vadd.f32 %v1391_v49, %v1382_v27  ;;  %v1383_v56 = vadd.f32 %v1379_v46, %v1369_v47 }
 0x265   : > { %v1393_v51 = vpop.permute.xlu1 %1392  ;;  %v1405_v60 = vpop.permute.xlu0 %1404 }
 0x266   : > { %v1410_v45 = vadd.f32 %v1405_v60, %v1396_v54  ;;  %v1397_v38 = vadd.f32 %v1393_v51, %v1383_v56 }
 0x269   : > { %v1407_v30 = vpop.permute.xlu1 %1406  ;;  %v1419_v55 = vpop.permute.xlu0 %1418 }
 0x26a   : > { %v1424_v1 = vadd.f32 %v1419_v55, %v1410_v45  ;;  %v1411_v63 = vadd.f32 %v1407_v30, %v1397_v38 }
 0x26d   : > { %v1421_v39 = vpop.permute.xlu1 %1420  ;;  %v1433_v61 = vpop.permute.xlu0 %1432 }
 0x26e   : > { %v1438_v0 = vadd.f32 %v1433_v61, %v1424_v1  ;;  %v1425_v3 = vadd.f32 %v1421_v39, %v1411_v63 }
 0x270   : > { %v1446_v4 = vadd.f32 %v1444_v52, %v1438_v0 }
 0x271   : > { %v1435_v18 = vpop.permute.xlu1 %1434  ;;  %v1455_v42 = vpop.permute.xlu0 %1454 }
 0x272   : > { %v1439_v7 = vadd.f32 %v1435_v18, %v1425_v3  ;;  %v1460_v13 = vadd.f32 %v1455_v42, %v1446_v4 }
 0x274   : > { %v1447_v9 = vadd.f32 %v1445_v8, %v1439_v7 }
 0x275   : > { %v1457_v10 = vpop.permute.xlu1 %1456  ;;  %v1469_v11 = vpop.permute.xlu0 %1468 }
 0x276   : > { %v1474_v16 = vadd.f32 %v1469_v11, %v1460_v13  ;;  %v1461_v17 = vadd.f32 %v1457_v10, %v1447_v9 }
 0x279   : > { %v1471_v53 = vpop.permute.xlu1 %1470  ;;  %v1483_v62 = vpop.permute.xlu0 %1482 }
 0x27a   : > { %v1488_v59 = vadd.f32 %v1483_v62, %v1474_v16  ;;  %v1475_v2 = vadd.f32 %v1471_v53, %v1461_v17 }
 0x27d   : > { %v1485_v14 = vpop.permute.xlu1 %1484  ;;  %v1497_v15 = vpop.permute.xlu0 %1496 }
 0x27e   : > { %v1502_v58 = vadd.f32 %v1497_v15, %v1488_v59  ;;  %v1489_v24 = vadd.f32 %v1485_v14, %v1475_v2 }
 0x281   : > { %v1499_v21 = vpop.permute.xlu1 %1498  ;;  %v1511_v19 = vpop.permute.xlu0 %1510 }
 0x282   : > { %v1516_v37 = vadd.f32 %v1511_v19, %v1502_v58  ;;  %v1503_v29 = vadd.f32 %v1499_v21, %v1489_v24 }
 0x285   : > { %v1513_v25 = vpop.permute.xlu1 %1512  ;;  %v1525_v26 = vpop.permute.xlu0 %1524 }
 0x286   : > { %v1530_v28 = vadd.f32 %v1525_v26, %v1516_v37  ;;  %v1517_v5 = vadd.f32 %v1513_v25, %v1503_v29 }
 0x288   : > { %v1532_v6 = vsub.f32 0.0, %v1530_v28 }
 0x289   : > { %v1527_v31 = vpop.permute.xlu1 %1526 }
 0x28a   : > { %v1534_v48 = vmul.f32 1.442695, %v1532_v6  ;;  %v1531_v32 = vadd.f32 %v1527_v31, %v1517_v5 }
 0x28c   : > { %1829 = vpow2.f32 %v1534_v48  ;;  %v1533_v33 = vsub.f32 0.0, %v1531_v32 }
 0x28e   : > { %v1536_v34 = vmul.f32 1.442695, %v1533_v33 }
 0x290   : > { %1831 = vpow2.f32 %v1536_v34 }
 0x299   : > { %v1830_v12 = vpop.eup %1829 }
 0x29a   : > { %v1538_v22 = vadd.f32 1.0, %v1830_v12 }
 0x29c   : > { %1833 = vrcp.f32 %v1538_v22 }
 0x29d   : > { %v1832_v35 = vpop.eup %1831 }
 0x29e   : > { %v1539_v36 = vadd.f32 1.0, %v1832_v35 }
 0x2a0   : > { %1835 = vrcp.f32 %v1539_v36 }
 0x2a9   : > { %v1834_v40 = vpop.eup %1833 }
 0x2aa   : > { %1544 = vst.msk [vmem:[%s173_s17] sm:$0xff] %vm182_vm0, %v1834_v40 }
 0x2ad   : > { %v1836_v41 = vpop.eup %1835 }
 0x2ae   : > { %1545 = vst.msk [vmem:[%s173_s17 + $0x8] sm:$0xff] %vm182_vm0, %v1836_v41 }
 0x2af   : > { %1889 = shalt.err (!%p1886_p0)
}
 0x2b0   : > { %s1890_s30 = scalar_lea.hbm %s2738_s5, 256  ;;  %s1894_s8 = scalar_lea.hbm %s2786_s2, 512 }
 0x2b1   : > { %p1891_p3 = scmp.ne.s32.totalorder %s2738_s5, %s1890_s30  ;;  %p1895_p1 = scmp.lt.s32.totalorder %s2738_s5, %s2786_s2 }
 0x2b2   : > { %p1896_p6 = scmp.lt.s32.totalorder %s1894_s8, %s1890_s30 }
 0x2b3   : > { %p1892_p5 = pnand %p1891_p3, %p2802_p13 }
 0x2b4   : > { %p1897_p11 = por %p1896_p6, %p1895_p1 }
 0x2b5   : > { %p1893_p4 = pneg %p1892_p5 }
 0x2b7   : > { %p1898_p12 = pnand %p1897_p11, %p1893_p4 }
 0x2b9   : > { %1901 = shalt.err (!%p1898_p12)
}
 0x2ba   : > { %s1959_s29 = smov 128   ;;  %s1960_s3 = smov 8  }
 0x2bb   : > { %1766 = dma.vmem_to_hbm [thread:$0]  (%p2802_p13), %s2740_s20, 256, %s2738_s5, %s1547_s7, %s1959_s29, %s1959_s29, %s1960_s3  }
 0x2bc PF: > { %s1575_s14 = sand.u32 1, %s1932_s9   ;;  %p2803_p7 = scmp.ne.s32.totalorder %s2794_s22, 0 }
 0x2bd   : > { %p2804_p8 = scmp.ge.s32.totalorder %s1944_s12, 2  ;;  %s1576_s17 = scalar_lea.sflag [#allocation5], %s1575_s14 }
 0x2bf   : > { %p1777_p9 = pnand %p2804_p8, %p2803_p7 }
 0x2c1   : > { %p1778_p10 = pneg %p1777_p9 }
 0x2c3   : > { %1927 = dma.done.wait (%p1778_p10), %s1576_s17, 256  }
 0x2c4   : > { %1929 = vsyncadd (%p1778_p10), %s1576_s17, 4294967040  ;;  %p16_p2 = scmp.ge.s32.totalorder %s2001_s15, 4   ;;  %s2805_s9 = smov %s1936_s10 }
 0x2c5   : > { %s2806_s10 = smov %s1940_s11  ;;  %s2807_s11 = smov %s2013_s18 }
 0x2c6   : > { %s2808_s12 = smov %s2001_s15  ;;  %18 = sbr.rel (!%p16_p2) target bundleno = 6 (0x6), region = 79 }
 0x2cb   :  { %1581 = vsyncpa [#allocation4], 1 }
 0x2cc   :  { %1583 = vsyncpa [#allocation4 + $0x1], 1 }
 0x2cd   :  { %1584 = vsyncpa [#allocation5], 1 }
 0x2ce   :  { %1586 = vsyncpa [#allocation5 + $0x1], 1 }
 0x2cf   :  { %1587 = vsyncpa [#allocation6], 1 }
 0x2d0   :  { %1589 = vsyncpa [#allocation6 + $0x1], 1 }

</bundles_post_ra>
